<compile_context>
chip_gen: v6e
topology: v6e:2x2x1
jax: 0.10.0
libtpu: 0.0.40
codegen_flags: <defaults>
</compile_context>

<pallas_src>
import functools

import jax
import jax.numpy as jnp
from jax.experimental import pallas as pl
from jax.experimental.pallas import tpu as pltpu

# ---------------- synthetic BERT config (small) ----------------
VOCAB = 64
MAX_POS = 32
HIDDEN = 32
HEADS = 2
HEAD_DIM = HIDDEN // HEADS
FFN = 64
LAYERS = 2
QKV_PAD = 128            # 3*HIDDEN = 96, padded to a full 128-lane register
LN_EPS = 1e-12           # BERT LayerNorm eps
COS_EPS = 1e-8           # torch cosine_similarity eps


# ---------------- in-kernel helpers ----------------
def _layernorm(x, g, b):
    mu = jnp.mean(x, axis=-1, keepdims=True)
    var = jnp.mean((x - mu) ** 2, axis=-1, keepdims=True)
    return (x - mu) * jax.lax.rsqrt(var + LN_EPS) * g + b


# ---------------- fused encoder kernel ----------------
def _encoder_kernel(x_ref, emb_g_ref, emb_b_ref,
                    wqkv_ref, bqkv_ref, wo_ref, bo_ref,
                    ln1g_ref, ln1b_ref, w1_ref, b1_ref,
                    w2_ref, b2_ref, ln2g_ref, ln2b_ref,
                    o_ref, *, batch, seq):
    # Grid axis 0 = which sentence; everything for one sentence is fused here.
    x = x_ref[0].astype(jnp.float32)                      # [batch*seq, HIDDEN]
    x = _layernorm(x, emb_g_ref[...], emb_b_ref[...])

    scale = 1.0 / jnp.sqrt(jnp.float32(HEAD_DIM))
    for li in range(LAYERS):
        # Fused QKV projection: one lane-dense [*,128] matmul instead of 3x[*,32].
        # TODO(synk): at real BERT sizes cast operands to bf16 (f32 accumulate)
        # for the v6e/v7x MXU; kept f32 at this toy size for reference fidelity.
        qkv = jnp.dot(x, wqkv_ref[li], preferred_element_type=jnp.float32)
        qkv = qkv + bqkv_ref[li]                          # [batch*seq, QKV_PAD]

        ctx_rows = []
        for b in range(batch):                            # static tiny loops
            r0 = b * seq
            head_ctx = []
            for h in range(HEADS):
                c0 = h * HEAD_DIM
                q = qkv[r0:r0 + seq, c0:c0 + HEAD_DIM]
                k = qkv[r0:r0 + seq, HIDDEN + c0:HIDDEN + c0 + HEAD_DIM]
                v = qkv[r0:r0 + seq, 2 * HIDDEN + c0:2 * HIDDEN + c0 + HEAD_DIM]
                s = jnp.dot(q, k.T, preferred_element_type=jnp.float32) * scale
                s = s - jnp.max(s, axis=-1, keepdims=True)
                p = jnp.exp(s)
                p = p * pl.reciprocal(jnp.sum(p, axis=-1, keepdims=True),
                                      approx=True)
                head_ctx.append(
                    jnp.dot(p, v, preferred_element_type=jnp.float32))
            ctx_rows.append(jnp.concatenate(head_ctx, axis=-1))
        ctx = jnp.concatenate(ctx_rows, axis=0)           # [batch*seq, HIDDEN]

        attn = jnp.dot(ctx, wo_ref[li], preferred_element_type=jnp.float32)
        attn = attn + bo_ref[li]
        x = _layernorm(x + attn, ln1g_ref[li], ln1b_ref[li])

        h1 = jnp.dot(x, w1_ref[li], preferred_element_type=jnp.float32)
        h1 = h1 + b1_ref[li]
        # TODO(synk): HF BERT default is exact erf-GELU; tanh approximation
        # kept here for Mosaic-safe lowering.
        h1 = jax.nn.gelu(h1, approximate=True)
        h2 = jnp.dot(h1, w2_ref[li], preferred_element_type=jnp.float32)
        h2 = h2 + b2_ref[li]
        x = _layernorm(x + h2, ln2g_ref[li], ln2b_ref[li])

    # CLS token (row 0 of each sequence).
    cls = jnp.concatenate([x[b * seq:b * seq + 1, :] for b in range(batch)],
                          axis=0)                         # [batch, HIDDEN]
    o_ref[0] = cls.astype(o_ref.dtype)


# ---------------- cosine-similarity loss kernel ----------------
def _cosine_loss_kernel(cls_ref, o_ref):
    a = cls_ref[0].astype(jnp.float32)                    # [batch, HIDDEN]
    b = cls_ref[1].astype(jnp.float32)
    dot = jnp.sum(a * b, axis=-1, keepdims=True)
    # torch.cosine_similarity clamps each norm separately.
    na = jnp.maximum(jnp.sqrt(jnp.sum(a * a, axis=-1, keepdims=True)), COS_EPS)
    nb = jnp.maximum(jnp.sqrt(jnp.sum(b * b, axis=-1, keepdims=True)), COS_EPS)
    sim = dot * pl.reciprocal(na * nb, approx=True)
    per_ex = (1.0 - sim) * 0.5                            # [batch, 1]
    o_ref[0, 0] = jnp.sum(per_ex) * (1.0 / per_ex.shape[0])


# ---------------- parameters (synthetic, deterministic) ----------------
def init_params(key):
    def normal(k, shape):
        return 0.02 * jax.random.normal(k, shape, dtype=jnp.float32)

    ks = jax.random.split(key, 9)
    wq = normal(ks[3], (LAYERS, HIDDEN, HIDDEN))
    wk = normal(ks[4], (LAYERS, HIDDEN, HIDDEN))
    wv = normal(ks[5], (LAYERS, HIDDEN, HIDDEN))
    wqkv = jnp.concatenate([wq, wk, wv], axis=-1)         # [L, H, 3H]
    wqkv = jnp.pad(wqkv, ((0, 0), (0, 0), (0, QKV_PAD - 3 * HIDDEN)))
    return {
        "word_emb": normal(ks[0], (VOCAB, HIDDEN)),
        "pos_emb": normal(ks[1], (MAX_POS, HIDDEN)),
        "type_emb": normal(ks[2], (2, HIDDEN)),
        "emb_ln_g": jnp.ones((1, HIDDEN), jnp.float32),
        "emb_ln_b": jnp.zeros((1, HIDDEN), jnp.float32),
        "wqkv": wqkv,
        "bqkv": jnp.zeros((LAYERS, 1, QKV_PAD), jnp.float32),
        "wo": normal(ks[6], (LAYERS, HIDDEN, HIDDEN)),
        "bo": jnp.zeros((LAYERS, 1, HIDDEN), jnp.float32),
        "ln1_g": jnp.ones((LAYERS, 1, HIDDEN), jnp.float32),
        "ln1_b": jnp.zeros((LAYERS, 1, HIDDEN), jnp.float32),
        "w1": normal(ks[7], (LAYERS, HIDDEN, FFN)),
        "b1": jnp.zeros((LAYERS, 1, FFN), jnp.float32),
        "w2": normal(ks[8], (LAYERS, FFN, HIDDEN)),
        "b2": jnp.zeros((LAYERS, 1, HIDDEN), jnp.float32),
        "ln2_g": jnp.ones((LAYERS, 1, HIDDEN), jnp.float32),
        "ln2_b": jnp.zeros((LAYERS, 1, HIDDEN), jnp.float32),
    }


def _full_spec(arr):
    # Whole-array VMEM-resident block, identical for every grid step.
    nd = arr.ndim
    return pl.BlockSpec(arr.shape, lambda i, _nd=nd: (0,) * _nd)


# ---------------- forward pass ----------------
def content_similarity_loss(params, input_ids_1, input_ids_2):
    batch, seq = input_ids_1.shape
    ids = jnp.stack([input_ids_1, input_ids_2], axis=0)   # [2, batch, seq]

    # Embedding gather (glue): word + position + token_type(=0).
    # TODO(synk): at real BERT sizes keep the embedding table in HBM
    # (memory_space=pl.ANY) and gather via DMA instead of XLA gather.
    x = (params["word_emb"][ids]
         + params["pos_emb"][:seq][None, None, :, :]
         + params["type_emb"][0][None, None, None, :])
    x = x.reshape(2, batch * seq, HIDDEN).astype(jnp.float32)

    weights = (params["emb_ln_g"], params["emb_ln_b"],
               params["wqkv"], params["bqkv"], params["wo"], params["bo"],
               params["ln1_g"], params["ln1_b"],
               params["w1"], params["b1"], params["w2"], params["b2"],
               params["ln2_g"], params["ln2_b"])

    cls = pl.pallas_call(
        functools.partial(_encoder_kernel, batch=batch, seq=seq),
        out_shape=jax.ShapeDtypeStruct((2, batch, HIDDEN), jnp.float32),
        grid=(2,),                                        # one step per sentence
        in_specs=[pl.BlockSpec((1, batch * seq, HIDDEN), lambda i: (i, 0, 0))]
                 + [_full_spec(w) for w in weights],
        out_specs=pl.BlockSpec((1, batch, HIDDEN), lambda i: (i, 0, 0)),
        compiler_params=pltpu.CompilerParams(
            dimension_semantics=("parallel",)),           # v7x: 2nd TensorCore
    )(x, *weights)

    loss = pl.pallas_call(
        _cosine_loss_kernel,
        out_shape=jax.ShapeDtypeStruct((1, 1), jnp.float32),
        in_specs=[pl.BlockSpec(memory_space=pltpu.MemorySpace.VMEM)],
        out_specs=pl.BlockSpec(memory_space=pltpu.MemorySpace.SMEM),
    )(cls)
    return loss[0, 0]


if __name__ == "__main__":
    key = jax.random.PRNGKey(0)
    kp, k1, k2 = jax.random.split(key, 3)
    params = init_params(kp)

    batch, seq = 2, 8
    input_ids_1 = jax.random.randint(k1, (batch, seq), 0, VOCAB, dtype=jnp.int32)
    input_ids_2 = jax.random.randint(k2, (batch, seq), 0, VOCAB, dtype=jnp.int32)

    loss = jax.jit(content_similarity_loss)(params, input_ids_1, input_ids_2)
    loss = jax.block_until_ready(loss)
    assert loss.shape == () and bool(jnp.isfinite(loss))
    print("KERNEL_OK")
</pallas_src>

<mosaic_0001>
module attributes {stable_mosaic.version = 11 : i64} {
  func.func @_cosine_loss_kernel(%arg0: memref<2x2x32xf32, #tpu.memory_space<vmem>>, %arg1: memref<1x1xf32, #tpu.memory_space<smem>>) attributes {dimension_semantics = [], scalar_prefetch = 0 : i64, scratch_operands = 0 : i64, tpu.core_type = #tpu.core_type<tc>} {
    %c0 = arith.constant 0 : index
    %c0_0 = arith.constant 0 : index
    %c0_1 = arith.constant 0 : index
    %0 = vector.load %arg0[%c0, %c0_0, %c0_1] : memref<2x2x32xf32, #tpu.memory_space<vmem>>, vector<1x2x32xf32>
    %1 = vector.shape_cast %0 : vector<1x2x32xf32> to vector<2x32xf32>
    %c1 = arith.constant 1 : index
    %c0_2 = arith.constant 0 : index
    %c0_3 = arith.constant 0 : index
    %2 = vector.load %arg0[%c1, %c0_2, %c0_3] : memref<2x2x32xf32, #tpu.memory_space<vmem>>, vector<1x2x32xf32>
    %3 = vector.shape_cast %2 : vector<1x2x32xf32> to vector<2x32xf32>
    %4 = arith.mulf %1, %3 : vector<2x32xf32>
    %cst = arith.constant dense<0.000000e+00> : vector<2xf32>
    %5 = vector.multi_reduction <add>, %4, %cst [1] : vector<2x32xf32> to vector<2xf32>
    %6 = vector.shape_cast %5 : vector<2xf32> to vector<2x1xf32>
    %7 = arith.mulf %1, %1 : vector<2x32xf32>
    %cst_4 = arith.constant dense<0.000000e+00> : vector<2xf32>
    %8 = vector.multi_reduction <add>, %7, %cst_4 [1] : vector<2x32xf32> to vector<2xf32>
    %9 = vector.shape_cast %8 : vector<2xf32> to vector<2x1xf32>
    %10 = math.sqrt %9 : vector<2x1xf32>
    %cst_5 = arith.constant 9.99999993E-9 : f32
    %11 = vector.broadcast %cst_5 : f32 to vector<2x1xf32>
    %12 = arith.maximumf %10, %11 : vector<2x1xf32>
    %13 = arith.mulf %3, %3 : vector<2x32xf32>
    %cst_6 = arith.constant dense<0.000000e+00> : vector<2xf32>
    %14 = vector.multi_reduction <add>, %13, %cst_6 [1] : vector<2x32xf32> to vector<2xf32>
    %15 = vector.shape_cast %14 : vector<2xf32> to vector<2x1xf32>
    %16 = math.sqrt %15 : vector<2x1xf32>
    %cst_7 = arith.constant 9.99999993E-9 : f32
    %17 = vector.broadcast %cst_7 : f32 to vector<2x1xf32>
    %18 = arith.maximumf %16, %17 : vector<2x1xf32>
    %19 = arith.mulf %12, %18 : vector<2x1xf32>
    %20 = tpu.reciprocal %19 {approx = true} : vector<2x1xf32> -> vector<2x1xf32>
    %21 = arith.mulf %6, %20 : vector<2x1xf32>
    %cst_8 = arith.constant 1.000000e+00 : f32
    %22 = vector.broadcast %cst_8 : f32 to vector<2x1xf32>
    %23 = arith.subf %22, %21 : vector<2x1xf32>
    %cst_9 = arith.constant 5.000000e-01 : f32
    %24 = vector.broadcast %cst_9 : f32 to vector<2x1xf32>
    %25 = arith.mulf %23, %24 : vector<2x1xf32>
    %26 = vector.shape_cast %25 : vector<2x1xf32> to vector<1x2x1xf32>
    %cst_10 = arith.constant dense<0.000000e+00> : vector<1xf32>
    %27 = vector.multi_reduction <add>, %26, %cst_10 [1, 2] : vector<1x2x1xf32> to vector<1xf32>
    %28 = vector.shape_cast %27 : vector<1xf32> to vector<1x1x1xf32>
    %29 = vector.extract %28[0, 0, 0] : f32 from vector<1x1x1xf32>
    %cst_11 = arith.constant 5.000000e-01 : f32
    %30 = arith.mulf %29, %cst_11 : f32
    %c0_12 = arith.constant 0 : index
    %c0_13 = arith.constant 0 : index
    %31 = memref.load %arg1[%c0_12, %c0_13] : memref<1x1xf32, #tpu.memory_space<smem>>
    memref.store %30, %arg1[%c0_12, %c0_13] : memref<1x1xf32, #tpu.memory_space<smem>>
    return
  }
}

module attributes {stable_mosaic.version = 11 : i64} {
  func.func @_encoder_kernel(%arg0: i32, %arg1: memref<1x16x32xf32, #tpu.memory_space<vmem>>, %arg2: memref<1x32xf32, #tpu.memory_space<vmem>>, %arg3: memref<1x32xf32, #tpu.memory_space<vmem>>, %arg4: memref<2x32x128xf32, #tpu.memory_space<vmem>>, %arg5: memref<2x1x128xf32, #tpu.memory_space<vmem>>, %arg6: memref<2x32x32xf32, #tpu.memory_space<vmem>>, %arg7: memref<2x1x32xf32, #tpu.memory_space<vmem>>, %arg8: memref<2x1x32xf32, #tpu.memory_space<vmem>>, %arg9: memref<2x1x32xf32, #tpu.memory_space<vmem>>, %arg10: memref<2x32x64xf32, #tpu.memory_space<vmem>>, %arg11: memref<2x1x64xf32, #tpu.memory_space<vmem>>, %arg12: memref<2x64x32xf32, #tpu.memory_space<vmem>>, %arg13: memref<2x1x32xf32, #tpu.memory_space<vmem>>, %arg14: memref<2x1x32xf32, #tpu.memory_space<vmem>>, %arg15: memref<2x1x32xf32, #tpu.memory_space<vmem>>, %arg16: memref<1x2x32xf32, #tpu.memory_space<vmem>>) attributes {dimension_semantics = [#tpu.dimension_semantics<parallel>], iteration_bounds = array<i64: 2>, scalar_prefetch = 0 : i64, scratch_operands = 0 : i64, tpu.core_type = #tpu.core_type<tc>, window_params = [{transform_indices = @transform_0, window_bounds = array<i64: 1, 16, 32>}, {pipeline_mode = #tpu.pipeline_mode<synchronous>, transform_indices = @transform_1, window_bounds = array<i64: 1, 32>}, {pipeline_mode = #tpu.pipeline_mode<synchronous>, transform_indices = @transform_2, window_bounds = array<i64: 1, 32>}, {pipeline_mode = #tpu.pipeline_mode<synchronous>, transform_indices = @transform_3, window_bounds = array<i64: 2, 32, 128>}, {pipeline_mode = #tpu.pipeline_mode<synchronous>, transform_indices = @transform_4, window_bounds = array<i64: 2, 1, 128>}, {pipeline_mode = #tpu.pipeline_mode<synchronous>, transform_indices = @transform_5, window_bounds = array<i64: 2, 32, 32>}, {pipeline_mode = #tpu.pipeline_mode<synchronous>, transform_indices = @transform_6, window_bounds = array<i64: 2, 1, 32>}, {pipeline_mode = #tpu.pipeline_mode<synchronous>, transform_indices = @transform_7, window_bounds = array<i64: 2, 1, 32>}, {pipeline_mode = #tpu.pipeline_mode<synchronous>, transform_indices = @transform_8, window_bounds = array<i64: 2, 1, 32>}, {pipeline_mode = #tpu.pipeline_mode<synchronous>, transform_indices = @transform_9, window_bounds = array<i64: 2, 32, 64>}, {pipeline_mode = #tpu.pipeline_mode<synchronous>, transform_indices = @transform_10, window_bounds = array<i64: 2, 1, 64>}, {pipeline_mode = #tpu.pipeline_mode<synchronous>, transform_indices = @transform_11, window_bounds = array<i64: 2, 64, 32>}, {pipeline_mode = #tpu.pipeline_mode<synchronous>, transform_indices = @transform_12, window_bounds = array<i64: 2, 1, 32>}, {pipeline_mode = #tpu.pipeline_mode<synchronous>, transform_indices = @transform_13, window_bounds = array<i64: 2, 1, 32>}, {pipeline_mode = #tpu.pipeline_mode<synchronous>, transform_indices = @transform_14, window_bounds = array<i64: 2, 1, 32>}, {transform_indices = @transform_15, window_bounds = array<i64: 1, 2, 32>}]} {
    %c0 = arith.constant 0 : index
    %c0_0 = arith.constant 0 : index
    %c0_1 = arith.constant 0 : index
    %0 = vector.load %arg1[%c0, %c0_0, %c0_1] : memref<1x16x32xf32, #tpu.memory_space<vmem>>, vector<1x16x32xf32>
    %1 = vector.shape_cast %0 : vector<1x16x32xf32> to vector<16x32xf32>
    %c0_2 = arith.constant 0 : index
    %c0_3 = arith.constant 0 : index
    %2 = vector.load %arg2[%c0_2, %c0_3] : memref<1x32xf32, #tpu.memory_space<vmem>>, vector<1x32xf32>
    %c0_4 = arith.constant 0 : index
    %c0_5 = arith.constant 0 : index
    %3 = vector.load %arg3[%c0_4, %c0_5] : memref<1x32xf32, #tpu.memory_space<vmem>>, vector<1x32xf32>
    %cst = arith.constant dense<0.000000e+00> : vector<16xf32>
    %4 = vector.multi_reduction <add>, %1, %cst [1] : vector<16x32xf32> to vector<16xf32>
    %5 = vector.shape_cast %4 : vector<16xf32> to vector<16x1xf32>
    %cst_6 = arith.constant 3.200000e+01 : f32
    %6 = vector.broadcast %cst_6 : f32 to vector<16x1xf32>
    %7 = arith.divf %5, %6 : vector<16x1xf32>
    %8 = vector.broadcast %7 : vector<16x1xf32> to vector<16x32xf32>
    %9 = arith.subf %1, %8 : vector<16x32xf32>
    %10 = arith.mulf %9, %9 : vector<16x32xf32>
    %cst_7 = arith.constant dense<0.000000e+00> : vector<16xf32>
    %11 = vector.multi_reduction <add>, %10, %cst_7 [1] : vector<16x32xf32> to vector<16xf32>
    %12 = vector.shape_cast %11 : vector<16xf32> to vector<16x1xf32>
    %cst_8 = arith.constant 3.200000e+01 : f32
    %13 = vector.broadcast %cst_8 : f32 to vector<16x1xf32>
    %14 = arith.divf %12, %13 : vector<16x1xf32>
    %15 = vector.broadcast %7 : vector<16x1xf32> to vector<16x32xf32>
    %16 = arith.subf %1, %15 : vector<16x32xf32>
    %cst_9 = arith.constant 9.99999996E-13 : f32
    %17 = vector.broadcast %cst_9 : f32 to vector<16x1xf32>
    %18 = arith.addf %14, %17 : vector<16x1xf32>
    %19 = math.rsqrt %18 : vector<16x1xf32>
    %20 = vector.broadcast %19 : vector<16x1xf32> to vector<16x32xf32>
    %21 = arith.mulf %16, %20 : vector<16x32xf32>
    %22 = vector.broadcast %2 : vector<1x32xf32> to vector<16x32xf32>
    %23 = arith.mulf %21, %22 : vector<16x32xf32>
    %24 = vector.broadcast %3 : vector<1x32xf32> to vector<16x32xf32>
    %25 = arith.addf %23, %24 : vector<16x32xf32>
    %cst_10 = arith.constant 1.600000e+01 : f32
    %26 = math.sqrt %cst_10 : f32
    %cst_11 = arith.constant 1.000000e+00 : f32
    %27 = arith.divf %cst_11, %26 : f32
    %c0_12 = arith.constant 0 : index
    %c0_13 = arith.constant 0 : index
    %c0_14 = arith.constant 0 : index
    %28 = vector.load %arg4[%c0_12, %c0_13, %c0_14] : memref<2x32x128xf32, #tpu.memory_space<vmem>>, vector<1x32x128xf32>
    %29 = vector.shape_cast %28 : vector<1x32x128xf32> to vector<32x128xf32>
    %cst_15 = arith.constant dense<0.000000e+00> : vector<16x128xf32>
    %30 = tpu.matmul %25, %29, %cst_15 {dimension_numbers = #tpu.dot_dimension_numbers<[1], [0], [0], [1], [0, 0, 1, 1], [], []>} : vector<16x32xf32>, vector<32x128xf32>, vector<16x128xf32> -> vector<16x128xf32>
    %c0_16 = arith.constant 0 : index
    %c0_17 = arith.constant 0 : index
    %c0_18 = arith.constant 0 : index
    %31 = vector.load %arg5[%c0_16, %c0_17, %c0_18] : memref<2x1x128xf32, #tpu.memory_space<vmem>>, vector<1x1x128xf32>
    %32 = vector.shape_cast %31 : vector<1x1x128xf32> to vector<1x128xf32>
    %33 = vector.broadcast %32 : vector<1x128xf32> to vector<16x128xf32>
    %34 = arith.addf %30, %33 : vector<16x128xf32>
    %35 = vector.extract_strided_slice %34 {offsets = [0, 0], sizes = [8, 16], strides = [1, 1]} : vector<16x128xf32> to vector<8x16xf32>
    %36 = vector.extract_strided_slice %34 {offsets = [0, 32], sizes = [8, 16], strides = [1, 1]} : vector<16x128xf32> to vector<8x16xf32>
    %37 = vector.extract_strided_slice %34 {offsets = [0, 64], sizes = [8, 16], strides = [1, 1]} : vector<16x128xf32> to vector<8x16xf32>
    %38 = tpu.transpose %36, [1, 0] : vector<8x16xf32> -> vector<16x8xf32>
    %cst_19 = arith.constant dense<0.000000e+00> : vector<8x8xf32>
    %39 = tpu.matmul %35, %38, %cst_19 {dimension_numbers = #tpu.dot_dimension_numbers<[1], [0], [0], [1], [0, 0, 1, 1], [], []>} : vector<8x16xf32>, vector<16x8xf32>, vector<8x8xf32> -> vector<8x8xf32>
    %40 = vector.broadcast %27 : f32 to vector<8x8xf32>
    %41 = arith.mulf %39, %40 : vector<8x8xf32>
    %cst_20 = arith.constant dense<0xFF800000> : vector<8xf32>
    %42 = vector.multi_reduction <maximumf>, %41, %cst_20 [1] : vector<8x8xf32> to vector<8xf32>
    %43 = vector.shape_cast %42 : vector<8xf32> to vector<8x1xf32>
    %44 = vector.broadcast %43 : vector<8x1xf32> to vector<8x8xf32>
    %45 = arith.subf %41, %44 : vector<8x8xf32>
    %46 = math.exp %45 : vector<8x8xf32>
    %cst_21 = arith.constant dense<0.000000e+00> : vector<8xf32>
    %47 = vector.multi_reduction <add>, %46, %cst_21 [1] : vector<8x8xf32> to vector<8xf32>
    %48 = vector.shape_cast %47 : vector<8xf32> to vector<8x1xf32>
    %49 = tpu.reciprocal %48 {approx = true} : vector<8x1xf32> -> vector<8x1xf32>
    %50 = vector.broadcast %49 : vector<8x1xf32> to vector<8x8xf32>
    %51 = arith.mulf %46, %50 : vector<8x8xf32>
    %cst_22 = arith.constant dense<0.000000e+00> : vector<8x16xf32>
    %52 = tpu.matmul %51, %37, %cst_22 {dimension_numbers = #tpu.dot_dimension_numbers<[1], [0], [0], [1], [0, 0, 1, 1], [], []>} : vector<8x8xf32>, vector<8x16xf32>, vector<8x16xf32> -> vector<8x16xf32>
    %53 = vector.extract_strided_slice %34 {offsets = [0, 16], sizes = [8, 16], strides = [1, 1]} : vector<16x128xf32> to vector<8x16xf32>
    %54 = vector.extract_strided_slice %34 {offsets = [0, 48], sizes = [8, 16], strides = [1, 1]} : vector<16x128xf32> to vector<8x16xf32>
    %55 = vector.extract_strided_slice %34 {offsets = [0, 80], sizes = [8, 16], strides = [1, 1]} : vector<16x128xf32> to vector<8x16xf32>
    %56 = tpu.transpose %54, [1, 0] : vector<8x16xf32> -> vector<16x8xf32>
    %cst_23 = arith.constant dense<0.000000e+00> : vector<8x8xf32>
    %57 = tpu.matmul %53, %56, %cst_23 {dimension_numbers = #tpu.dot_dimension_numbers<[1], [0], [0], [1], [0, 0, 1, 1], [], []>} : vector<8x16xf32>, vector<16x8xf32>, vector<8x8xf32> -> vector<8x8xf32>
    %58 = vector.broadcast %27 : f32 to vector<8x8xf32>
    %59 = arith.mulf %57, %58 : vector<8x8xf32>
    %cst_24 = arith.constant dense<0xFF800000> : vector<8xf32>
    %60 = vector.multi_reduction <maximumf>, %59, %cst_24 [1] : vector<8x8xf32> to vector<8xf32>
    %61 = vector.shape_cast %60 : vector<8xf32> to vector<8x1xf32>
    %62 = vector.broadcast %61 : vector<8x1xf32> to vector<8x8xf32>
    %63 = arith.subf %59, %62 : vector<8x8xf32>
    %64 = math.exp %63 : vector<8x8xf32>
    %cst_25 = arith.constant dense<0.000000e+00> : vector<8xf32>
    %65 = vector.multi_reduction <add>, %64, %cst_25 [1] : vector<8x8xf32> to vector<8xf32>
    %66 = vector.shape_cast %65 : vector<8xf32> to vector<8x1xf32>
    %67 = tpu.reciprocal %66 {approx = true} : vector<8x1xf32> -> vector<8x1xf32>
    %68 = vector.broadcast %67 : vector<8x1xf32> to vector<8x8xf32>
    %69 = arith.mulf %64, %68 : vector<8x8xf32>
    %cst_26 = arith.constant dense<0.000000e+00> : vector<8x16xf32>
    %70 = tpu.matmul %69, %55, %cst_26 {dimension_numbers = #tpu.dot_dimension_numbers<[1], [0], [0], [1], [0, 0, 1, 1], [], []>} : vector<8x8xf32>, vector<8x16xf32>, vector<8x16xf32> -> vector<8x16xf32>
    %71 = tpu.concatenate %52, %70 in 1 : vector<8x16xf32>, vector<8x16xf32> -> vector<8x32xf32>
    %72 = vector.extract_strided_slice %34 {offsets = [8, 0], sizes = [8, 16], strides = [1, 1]} : vector<16x128xf32> to vector<8x16xf32>
    %73 = vector.extract_strided_slice %34 {offsets = [8, 32], sizes = [8, 16], strides = [1, 1]} : vector<16x128xf32> to vector<8x16xf32>
    %74 = vector.extract_strided_slice %34 {offsets = [8, 64], sizes = [8, 16], strides = [1, 1]} : vector<16x128xf32> to vector<8x16xf32>
    %75 = tpu.transpose %73, [1, 0] : vector<8x16xf32> -> vector<16x8xf32>
    %cst_27 = arith.constant dense<0.000000e+00> : vector<8x8xf32>
    %76 = tpu.matmul %72, %75, %cst_27 {dimension_numbers = #tpu.dot_dimension_numbers<[1], [0], [0], [1], [0, 0, 1, 1], [], []>} : vector<8x16xf32>, vector<16x8xf32>, vector<8x8xf32> -> vector<8x8xf32>
    %77 = vector.broadcast %27 : f32 to vector<8x8xf32>
    %78 = arith.mulf %76, %77 : vector<8x8xf32>
    %cst_28 = arith.constant dense<0xFF800000> : vector<8xf32>
    %79 = vector.multi_reduction <maximumf>, %78, %cst_28 [1] : vector<8x8xf32> to vector<8xf32>
    %80 = vector.shape_cast %79 : vector<8xf32> to vector<8x1xf32>
    %81 = vector.broadcast %80 : vector<8x1xf32> to vector<8x8xf32>
    %82 = arith.subf %78, %81 : vector<8x8xf32>
    %83 = math.exp %82 : vector<8x8xf32>
    %cst_29 = arith.constant dense<0.000000e+00> : vector<8xf32>
    %84 = vector.multi_reduction <add>, %83, %cst_29 [1] : vector<8x8xf32> to vector<8xf32>
    %85 = vector.shape_cast %84 : vector<8xf32> to vector<8x1xf32>
    %86 = tpu.reciprocal %85 {approx = true} : vector<8x1xf32> -> vector<8x1xf32>
    %87 = vector.broadcast %86 : vector<8x1xf32> to vector<8x8xf32>
    %88 = arith.mulf %83, %87 : vector<8x8xf32>
    %cst_30 = arith.constant dense<0.000000e+00> : vector<8x16xf32>
    %89 = tpu.matmul %88, %74, %cst_30 {dimension_numbers = #tpu.dot_dimension_numbers<[1], [0], [0], [1], [0, 0, 1, 1], [], []>} : vector<8x8xf32>, vector<8x16xf32>, vector<8x16xf32> -> vector<8x16xf32>
    %90 = vector.extract_strided_slice %34 {offsets = [8, 16], sizes = [8, 16], strides = [1, 1]} : vector<16x128xf32> to vector<8x16xf32>
    %91 = vector.extract_strided_slice %34 {offsets = [8, 48], sizes = [8, 16], strides = [1, 1]} : vector<16x128xf32> to vector<8x16xf32>
    %92 = vector.extract_strided_slice %34 {offsets = [8, 80], sizes = [8, 16], strides = [1, 1]} : vector<16x128xf32> to vector<8x16xf32>
    %93 = tpu.transpose %91, [1, 0] : vector<8x16xf32> -> vector<16x8xf32>
    %cst_31 = arith.constant dense<0.000000e+00> : vector<8x8xf32>
    %94 = tpu.matmul %90, %93, %cst_31 {dimension_numbers = #tpu.dot_dimension_numbers<[1], [0], [0], [1], [0, 0, 1, 1], [], []>} : vector<8x16xf32>, vector<16x8xf32>, vector<8x8xf32> -> vector<8x8xf32>
    %95 = vector.broadcast %27 : f32 to vector<8x8xf32>
    %96 = arith.mulf %94, %95 : vector<8x8xf32>
    %cst_32 = arith.constant dense<0xFF800000> : vector<8xf32>
    %97 = vector.multi_reduction <maximumf>, %96, %cst_32 [1] : vector<8x8xf32> to vector<8xf32>
    %98 = vector.shape_cast %97 : vector<8xf32> to vector<8x1xf32>
    %99 = vector.broadcast %98 : vector<8x1xf32> to vector<8x8xf32>
    %100 = arith.subf %96, %99 : vector<8x8xf32>
    %101 = math.exp %100 : vector<8x8xf32>
    %cst_33 = arith.constant dense<0.000000e+00> : vector<8xf32>
    %102 = vector.multi_reduction <add>, %101, %cst_33 [1] : vector<8x8xf32> to vector<8xf32>
    %103 = vector.shape_cast %102 : vector<8xf32> to vector<8x1xf32>
    %104 = tpu.reciprocal %103 {approx = true} : vector<8x1xf32> -> vector<8x1xf32>
    %105 = vector.broadcast %104 : vector<8x1xf32> to vector<8x8xf32>
    %106 = arith.mulf %101, %105 : vector<8x8xf32>
    %cst_34 = arith.constant dense<0.000000e+00> : vector<8x16xf32>
    %107 = tpu.matmul %106, %92, %cst_34 {dimension_numbers = #tpu.dot_dimension_numbers<[1], [0], [0], [1], [0, 0, 1, 1], [], []>} : vector<8x8xf32>, vector<8x16xf32>, vector<8x16xf32> -> vector<8x16xf32>
    %108 = tpu.concatenate %89, %107 in 1 : vector<8x16xf32>, vector<8x16xf32> -> vector<8x32xf32>
    %109 = tpu.concatenate %71, %108 in 0 : vector<8x32xf32>, vector<8x32xf32> -> vector<16x32xf32>
    %c0_35 = arith.constant 0 : index
    %c0_36 = arith.constant 0 : index
    %c0_37 = arith.constant 0 : index
    %110 = vector.load %arg6[%c0_35, %c0_36, %c0_37] : memref<2x32x32xf32, #tpu.memory_space<vmem>>, vector<1x32x32xf32>
    %111 = vector.shape_cast %110 : vector<1x32x32xf32> to vector<32x32xf32>
    %cst_38 = arith.constant dense<0.000000e+00> : vector<16x32xf32>
    %112 = tpu.matmul %109, %111, %cst_38 {dimension_numbers = #tpu.dot_dimension_numbers<[1], [0], [0], [1], [0, 0, 1, 1], [], []>} : vector<16x32xf32>, vector<32x32xf32>, vector<16x32xf32> -> vector<16x32xf32>
    %c0_39 = arith.constant 0 : index
    %c0_40 = arith.constant 0 : index
    %c0_41 = arith.constant 0 : index
    %113 = vector.load %arg7[%c0_39, %c0_40, %c0_41] : memref<2x1x32xf32, #tpu.memory_space<vmem>>, vector<1x1x32xf32>
    %114 = vector.shape_cast %113 : vector<1x1x32xf32> to vector<1x32xf32>
    %115 = vector.broadcast %114 : vector<1x32xf32> to vector<16x32xf32>
    %116 = arith.addf %112, %115 : vector<16x32xf32>
    %117 = arith.addf %25, %116 : vector<16x32xf32>
    %c0_42 = arith.constant 0 : index
    %c0_43 = arith.constant 0 : index
    %c0_44 = arith.constant 0 : index
    %118 = vector.load %arg8[%c0_42, %c0_43, %c0_44] : memref<2x1x32xf32, #tpu.memory_space<vmem>>, vector<1x1x32xf32>
    %119 = vector.shape_cast %118 : vector<1x1x32xf32> to vector<1x32xf32>
    %c0_45 = arith.constant 0 : index
    %c0_46 = arith.constant 0 : index
    %c0_47 = arith.constant 0 : index
    %120 = vector.load %arg9[%c0_45, %c0_46, %c0_47] : memref<2x1x32xf32, #tpu.memory_space<vmem>>, vector<1x1x32xf32>
    %121 = vector.shape_cast %120 : vector<1x1x32xf32> to vector<1x32xf32>
    %cst_48 = arith.constant dense<0.000000e+00> : vector<16xf32>
    %122 = vector.multi_reduction <add>, %117, %cst_48 [1] : vector<16x32xf32> to vector<16xf32>
    %123 = vector.shape_cast %122 : vector<16xf32> to vector<16x1xf32>
    %cst_49 = arith.constant 3.200000e+01 : f32
    %124 = vector.broadcast %cst_49 : f32 to vector<16x1xf32>
    %125 = arith.divf %123, %124 : vector<16x1xf32>
    %126 = vector.broadcast %125 : vector<16x1xf32> to vector<16x32xf32>
    %127 = arith.subf %117, %126 : vector<16x32xf32>
    %128 = arith.mulf %127, %127 : vector<16x32xf32>
    %cst_50 = arith.constant dense<0.000000e+00> : vector<16xf32>
    %129 = vector.multi_reduction <add>, %128, %cst_50 [1] : vector<16x32xf32> to vector<16xf32>
    %130 = vector.shape_cast %129 : vector<16xf32> to vector<16x1xf32>
    %cst_51 = arith.constant 3.200000e+01 : f32
    %131 = vector.broadcast %cst_51 : f32 to vector<16x1xf32>
    %132 = arith.divf %130, %131 : vector<16x1xf32>
    %133 = vector.broadcast %125 : vector<16x1xf32> to vector<16x32xf32>
    %134 = arith.subf %117, %133 : vector<16x32xf32>
    %cst_52 = arith.constant 9.99999996E-13 : f32
    %135 = vector.broadcast %cst_52 : f32 to vector<16x1xf32>
    %136 = arith.addf %132, %135 : vector<16x1xf32>
    %137 = math.rsqrt %136 : vector<16x1xf32>
    %138 = vector.broadcast %137 : vector<16x1xf32> to vector<16x32xf32>
    %139 = arith.mulf %134, %138 : vector<16x32xf32>
    %140 = vector.broadcast %119 : vector<1x32xf32> to vector<16x32xf32>
    %141 = arith.mulf %139, %140 : vector<16x32xf32>
    %142 = vector.broadcast %121 : vector<1x32xf32> to vector<16x32xf32>
    %143 = arith.addf %141, %142 : vector<16x32xf32>
    %c0_53 = arith.constant 0 : index
    %c0_54 = arith.constant 0 : index
    %c0_55 = arith.constant 0 : index
    %144 = vector.load %arg10[%c0_53, %c0_54, %c0_55] : memref<2x32x64xf32, #tpu.memory_space<vmem>>, vector<1x32x64xf32>
    %145 = vector.shape_cast %144 : vector<1x32x64xf32> to vector<32x64xf32>
    %cst_56 = arith.constant dense<0.000000e+00> : vector<16x64xf32>
    %146 = tpu.matmul %143, %145, %cst_56 {dimension_numbers = #tpu.dot_dimension_numbers<[1], [0], [0], [1], [0, 0, 1, 1], [], []>} : vector<16x32xf32>, vector<32x64xf32>, vector<16x64xf32> -> vector<16x64xf32>
    %c0_57 = arith.constant 0 : index
    %c0_58 = arith.constant 0 : index
    %c0_59 = arith.constant 0 : index
    %147 = vector.load %arg11[%c0_57, %c0_58, %c0_59] : memref<2x1x64xf32, #tpu.memory_space<vmem>>, vector<1x1x64xf32>
    %148 = vector.shape_cast %147 : vector<1x1x64xf32> to vector<1x64xf32>
    %149 = vector.broadcast %148 : vector<1x64xf32> to vector<16x64xf32>
    %150 = arith.addf %146, %149 : vector<16x64xf32>
    %151 = arith.mulf %150, %150 : vector<16x64xf32>
    %152 = arith.mulf %150, %151 : vector<16x64xf32>
    %cst_60 = arith.constant 4.471500e-02 : f32
    %153 = vector.broadcast %cst_60 : f32 to vector<16x64xf32>
    %154 = arith.mulf %153, %152 : vector<16x64xf32>
    %155 = arith.addf %150, %154 : vector<16x64xf32>
    %cst_61 = arith.constant 0.797884583 : f32
    %156 = vector.broadcast %cst_61 : f32 to vector<16x64xf32>
    %157 = arith.mulf %156, %155 : vector<16x64xf32>
    %158 = math.tanh %157 : vector<16x64xf32>
    %cst_62 = arith.constant 1.000000e+00 : f32
    %159 = vector.broadcast %cst_62 : f32 to vector<16x64xf32>
    %160 = arith.addf %159, %158 : vector<16x64xf32>
    %cst_63 = arith.constant 5.000000e-01 : f32
    %161 = vector.broadcast %cst_63 : f32 to vector<16x64xf32>
    %162 = arith.mulf %161, %160 : vector<16x64xf32>
    %163 = arith.mulf %150, %162 : vector<16x64xf32>
    %c0_64 = arith.constant 0 : index
    %c0_65 = arith.constant 0 : index
    %c0_66 = arith.constant 0 : index
    %164 = vector.load %arg12[%c0_64, %c0_65, %c0_66] : memref<2x64x32xf32, #tpu.memory_space<vmem>>, vector<1x64x32xf32>
    %165 = vector.shape_cast %164 : vector<1x64x32xf32> to vector<64x32xf32>
    %cst_67 = arith.constant dense<0.000000e+00> : vector<16x32xf32>
    %166 = tpu.matmul %163, %165, %cst_67 {dimension_numbers = #tpu.dot_dimension_numbers<[1], [0], [0], [1], [0, 0, 1, 1], [], []>} : vector<16x64xf32>, vector<64x32xf32>, vector<16x32xf32> -> vector<16x32xf32>
    %c0_68 = arith.constant 0 : index
    %c0_69 = arith.constant 0 : index
    %c0_70 = arith.constant 0 : index
    %167 = vector.load %arg13[%c0_68, %c0_69, %c0_70] : memref<2x1x32xf32, #tpu.memory_space<vmem>>, vector<1x1x32xf32>
    %168 = vector.shape_cast %167 : vector<1x1x32xf32> to vector<1x32xf32>
    %169 = vector.broadcast %168 : vector<1x32xf32> to vector<16x32xf32>
    %170 = arith.addf %166, %169 : vector<16x32xf32>
    %171 = arith.addf %143, %170 : vector<16x32xf32>
    %c0_71 = arith.constant 0 : index
    %c0_72 = arith.constant 0 : index
    %c0_73 = arith.constant 0 : index
    %172 = vector.load %arg14[%c0_71, %c0_72, %c0_73] : memref<2x1x32xf32, #tpu.memory_space<vmem>>, vector<1x1x32xf32>
    %173 = vector.shape_cast %172 : vector<1x1x32xf32> to vector<1x32xf32>
    %c0_74 = arith.constant 0 : index
    %c0_75 = arith.constant 0 : index
    %c0_76 = arith.constant 0 : index
    %174 = vector.load %arg15[%c0_74, %c0_75, %c0_76] : memref<2x1x32xf32, #tpu.memory_space<vmem>>, vector<1x1x32xf32>
    %175 = vector.shape_cast %174 : vector<1x1x32xf32> to vector<1x32xf32>
    %cst_77 = arith.constant dense<0.000000e+00> : vector<16xf32>
    %176 = vector.multi_reduction <add>, %171, %cst_77 [1] : vector<16x32xf32> to vector<16xf32>
    %177 = vector.shape_cast %176 : vector<16xf32> to vector<16x1xf32>
    %cst_78 = arith.constant 3.200000e+01 : f32
    %178 = vector.broadcast %cst_78 : f32 to vector<16x1xf32>
    %179 = arith.divf %177, %178 : vector<16x1xf32>
    %180 = vector.broadcast %179 : vector<16x1xf32> to vector<16x32xf32>
    %181 = arith.subf %171, %180 : vector<16x32xf32>
    %182 = arith.mulf %181, %181 : vector<16x32xf32>
    %cst_79 = arith.constant dense<0.000000e+00> : vector<16xf32>
    %183 = vector.multi_reduction <add>, %182, %cst_79 [1] : vector<16x32xf32> to vector<16xf32>
    %184 = vector.shape_cast %183 : vector<16xf32> to vector<16x1xf32>
    %cst_80 = arith.constant 3.200000e+01 : f32
    %185 = vector.broadcast %cst_80 : f32 to vector<16x1xf32>
    %186 = arith.divf %184, %185 : vector<16x1xf32>
    %187 = vector.broadcast %179 : vector<16x1xf32> to vector<16x32xf32>
    %188 = arith.subf %171, %187 : vector<16x32xf32>
    %cst_81 = arith.constant 9.99999996E-13 : f32
    %189 = vector.broadcast %cst_81 : f32 to vector<16x1xf32>
    %190 = arith.addf %186, %189 : vector<16x1xf32>
    %191 = math.rsqrt %190 : vector<16x1xf32>
    %192 = vector.broadcast %191 : vector<16x1xf32> to vector<16x32xf32>
    %193 = arith.mulf %188, %192 : vector<16x32xf32>
    %194 = vector.broadcast %173 : vector<1x32xf32> to vector<16x32xf32>
    %195 = arith.mulf %193, %194 : vector<16x32xf32>
    %196 = vector.broadcast %175 : vector<1x32xf32> to vector<16x32xf32>
    %197 = arith.addf %195, %196 : vector<16x32xf32>
    %c1 = arith.constant 1 : index
    %c0_82 = arith.constant 0 : index
    %c0_83 = arith.constant 0 : index
    %198 = vector.load %arg4[%c1, %c0_82, %c0_83] : memref<2x32x128xf32, #tpu.memory_space<vmem>>, vector<1x32x128xf32>
    %199 = vector.shape_cast %198 : vector<1x32x128xf32> to vector<32x128xf32>
    %cst_84 = arith.constant dense<0.000000e+00> : vector<16x128xf32>
    %200 = tpu.matmul %197, %199, %cst_84 {dimension_numbers = #tpu.dot_dimension_numbers<[1], [0], [0], [1], [0, 0, 1, 1], [], []>} : vector<16x32xf32>, vector<32x128xf32>, vector<16x128xf32> -> vector<16x128xf32>
    %c1_85 = arith.constant 1 : index
    %c0_86 = arith.constant 0 : index
    %c0_87 = arith.constant 0 : index
    %201 = vector.load %arg5[%c1_85, %c0_86, %c0_87] : memref<2x1x128xf32, #tpu.memory_space<vmem>>, vector<1x1x128xf32>
    %202 = vector.shape_cast %201 : vector<1x1x128xf32> to vector<1x128xf32>
    %203 = vector.broadcast %202 : vector<1x128xf32> to vector<16x128xf32>
    %204 = arith.addf %200, %203 : vector<16x128xf32>
    %205 = vector.extract_strided_slice %204 {offsets = [0, 0], sizes = [8, 16], strides = [1, 1]} : vector<16x128xf32> to vector<8x16xf32>
    %206 = vector.extract_strided_slice %204 {offsets = [0, 32], sizes = [8, 16], strides = [1, 1]} : vector<16x128xf32> to vector<8x16xf32>
    %207 = vector.extract_strided_slice %204 {offsets = [0, 64], sizes = [8, 16], strides = [1, 1]} : vector<16x128xf32> to vector<8x16xf32>
    %208 = tpu.transpose %206, [1, 0] : vector<8x16xf32> -> vector<16x8xf32>
    %cst_88 = arith.constant dense<0.000000e+00> : vector<8x8xf32>
    %209 = tpu.matmul %205, %208, %cst_88 {dimension_numbers = #tpu.dot_dimension_numbers<[1], [0], [0], [1], [0, 0, 1, 1], [], []>} : vector<8x16xf32>, vector<16x8xf32>, vector<8x8xf32> -> vector<8x8xf32>
    %210 = vector.broadcast %27 : f32 to vector<8x8xf32>
    %211 = arith.mulf %209, %210 : vector<8x8xf32>
    %cst_89 = arith.constant dense<0xFF800000> : vector<8xf32>
    %212 = vector.multi_reduction <maximumf>, %211, %cst_89 [1] : vector<8x8xf32> to vector<8xf32>
    %213 = vector.shape_cast %212 : vector<8xf32> to vector<8x1xf32>
    %214 = vector.broadcast %213 : vector<8x1xf32> to vector<8x8xf32>
    %215 = arith.subf %211, %214 : vector<8x8xf32>
    %216 = math.exp %215 : vector<8x8xf32>
    %cst_90 = arith.constant dense<0.000000e+00> : vector<8xf32>
    %217 = vector.multi_reduction <add>, %216, %cst_90 [1] : vector<8x8xf32> to vector<8xf32>
    %218 = vector.shape_cast %217 : vector<8xf32> to vector<8x1xf32>
    %219 = tpu.reciprocal %218 {approx = true} : vector<8x1xf32> -> vector<8x1xf32>
    %220 = vector.broadcast %219 : vector<8x1xf32> to vector<8x8xf32>
    %221 = arith.mulf %216, %220 : vector<8x8xf32>
    %cst_91 = arith.constant dense<0.000000e+00> : vector<8x16xf32>
    %222 = tpu.matmul %221, %207, %cst_91 {dimension_numbers = #tpu.dot_dimension_numbers<[1], [0], [0], [1], [0, 0, 1, 1], [], []>} : vector<8x8xf32>, vector<8x16xf32>, vector<8x16xf32> -> vector<8x16xf32>
    %223 = vector.extract_strided_slice %204 {offsets = [0, 16], sizes = [8, 16], strides = [1, 1]} : vector<16x128xf32> to vector<8x16xf32>
    %224 = vector.extract_strided_slice %204 {offsets = [0, 48], sizes = [8, 16], strides = [1, 1]} : vector<16x128xf32> to vector<8x16xf32>
    %225 = vector.extract_strided_slice %204 {offsets = [0, 80], sizes = [8, 16], strides = [1, 1]} : vector<16x128xf32> to vector<8x16xf32>
    %226 = tpu.transpose %224, [1, 0] : vector<8x16xf32> -> vector<16x8xf32>
    %cst_92 = arith.constant dense<0.000000e+00> : vector<8x8xf32>
    %227 = tpu.matmul %223, %226, %cst_92 {dimension_numbers = #tpu.dot_dimension_numbers<[1], [0], [0], [1], [0, 0, 1, 1], [], []>} : vector<8x16xf32>, vector<16x8xf32>, vector<8x8xf32> -> vector<8x8xf32>
    %228 = vector.broadcast %27 : f32 to vector<8x8xf32>
    %229 = arith.mulf %227, %228 : vector<8x8xf32>
    %cst_93 = arith.constant dense<0xFF800000> : vector<8xf32>
    %230 = vector.multi_reduction <maximumf>, %229, %cst_93 [1] : vector<8x8xf32> to vector<8xf32>
    %231 = vector.shape_cast %230 : vector<8xf32> to vector<8x1xf32>
    %232 = vector.broadcast %231 : vector<8x1xf32> to vector<8x8xf32>
    %233 = arith.subf %229, %232 : vector<8x8xf32>
    %234 = math.exp %233 : vector<8x8xf32>
    %cst_94 = arith.constant dense<0.000000e+00> : vector<8xf32>
    %235 = vector.multi_reduction <add>, %234, %cst_94 [1] : vector<8x8xf32> to vector<8xf32>
    %236 = vector.shape_cast %235 : vector<8xf32> to vector<8x1xf32>
    %237 = tpu.reciprocal %236 {approx = true} : vector<8x1xf32> -> vector<8x1xf32>
    %238 = vector.broadcast %237 : vector<8x1xf32> to vector<8x8xf32>
    %239 = arith.mulf %234, %238 : vector<8x8xf32>
    %cst_95 = arith.constant dense<0.000000e+00> : vector<8x16xf32>
    %240 = tpu.matmul %239, %225, %cst_95 {dimension_numbers = #tpu.dot_dimension_numbers<[1], [0], [0], [1], [0, 0, 1, 1], [], []>} : vector<8x8xf32>, vector<8x16xf32>, vector<8x16xf32> -> vector<8x16xf32>
    %241 = tpu.concatenate %222, %240 in 1 : vector<8x16xf32>, vector<8x16xf32> -> vector<8x32xf32>
    %242 = vector.extract_strided_slice %204 {offsets = [8, 0], sizes = [8, 16], strides = [1, 1]} : vector<16x128xf32> to vector<8x16xf32>
    %243 = vector.extract_strided_slice %204 {offsets = [8, 32], sizes = [8, 16], strides = [1, 1]} : vector<16x128xf32> to vector<8x16xf32>
    %244 = vector.extract_strided_slice %204 {offsets = [8, 64], sizes = [8, 16], strides = [1, 1]} : vector<16x128xf32> to vector<8x16xf32>
    %245 = tpu.transpose %243, [1, 0] : vector<8x16xf32> -> vector<16x8xf32>
    %cst_96 = arith.constant dense<0.000000e+00> : vector<8x8xf32>
    %246 = tpu.matmul %242, %245, %cst_96 {dimension_numbers = #tpu.dot_dimension_numbers<[1], [0], [0], [1], [0, 0, 1, 1], [], []>} : vector<8x16xf32>, vector<16x8xf32>, vector<8x8xf32> -> vector<8x8xf32>
    %247 = vector.broadcast %27 : f32 to vector<8x8xf32>
    %248 = arith.mulf %246, %247 : vector<8x8xf32>
    %cst_97 = arith.constant dense<0xFF800000> : vector<8xf32>
    %249 = vector.multi_reduction <maximumf>, %248, %cst_97 [1] : vector<8x8xf32> to vector<8xf32>
    %250 = vector.shape_cast %249 : vector<8xf32> to vector<8x1xf32>
    %251 = vector.broadcast %250 : vector<8x1xf32> to vector<8x8xf32>
    %252 = arith.subf %248, %251 : vector<8x8xf32>
    %253 = math.exp %252 : vector<8x8xf32>
    %cst_98 = arith.constant dense<0.000000e+00> : vector<8xf32>
    %254 = vector.multi_reduction <add>, %253, %cst_98 [1] : vector<8x8xf32> to vector<8xf32>
    %255 = vector.shape_cast %254 : vector<8xf32> to vector<8x1xf32>
    %256 = tpu.reciprocal %255 {approx = true} : vector<8x1xf32> -> vector<8x1xf32>
    %257 = vector.broadcast %256 : vector<8x1xf32> to vector<8x8xf32>
    %258 = arith.mulf %253, %257 : vector<8x8xf32>
    %cst_99 = arith.constant dense<0.000000e+00> : vector<8x16xf32>
    %259 = tpu.matmul %258, %244, %cst_99 {dimension_numbers = #tpu.dot_dimension_numbers<[1], [0], [0], [1], [0, 0, 1, 1], [], []>} : vector<8x8xf32>, vector<8x16xf32>, vector<8x16xf32> -> vector<8x16xf32>
    %260 = vector.extract_strided_slice %204 {offsets = [8, 16], sizes = [8, 16], strides = [1, 1]} : vector<16x128xf32> to vector<8x16xf32>
    %261 = vector.extract_strided_slice %204 {offsets = [8, 48], sizes = [8, 16], strides = [1, 1]} : vector<16x128xf32> to vector<8x16xf32>
    %262 = vector.extract_strided_slice %204 {offsets = [8, 80], sizes = [8, 16], strides = [1, 1]} : vector<16x128xf32> to vector<8x16xf32>
    %263 = tpu.transpose %261, [1, 0] : vector<8x16xf32> -> vector<16x8xf32>
    %cst_100 = arith.constant dense<0.000000e+00> : vector<8x8xf32>
    %264 = tpu.matmul %260, %263, %cst_100 {dimension_numbers = #tpu.dot_dimension_numbers<[1], [0], [0], [1], [0, 0, 1, 1], [], []>} : vector<8x16xf32>, vector<16x8xf32>, vector<8x8xf32> -> vector<8x8xf32>
    %265 = vector.broadcast %27 : f32 to vector<8x8xf32>
    %266 = arith.mulf %264, %265 : vector<8x8xf32>
    %cst_101 = arith.constant dense<0xFF800000> : vector<8xf32>
    %267 = vector.multi_reduction <maximumf>, %266, %cst_101 [1] : vector<8x8xf32> to vector<8xf32>
    %268 = vector.shape_cast %267 : vector<8xf32> to vector<8x1xf32>
    %269 = vector.broadcast %268 : vector<8x1xf32> to vector<8x8xf32>
    %270 = arith.subf %266, %269 : vector<8x8xf32>
    %271 = math.exp %270 : vector<8x8xf32>
    %cst_102 = arith.constant dense<0.000000e+00> : vector<8xf32>
    %272 = vector.multi_reduction <add>, %271, %cst_102 [1] : vector<8x8xf32> to vector<8xf32>
    %273 = vector.shape_cast %272 : vector<8xf32> to vector<8x1xf32>
    %274 = tpu.reciprocal %273 {approx = true} : vector<8x1xf32> -> vector<8x1xf32>
    %275 = vector.broadcast %274 : vector<8x1xf32> to vector<8x8xf32>
    %276 = arith.mulf %271, %275 : vector<8x8xf32>
    %cst_103 = arith.constant dense<0.000000e+00> : vector<8x16xf32>
    %277 = tpu.matmul %276, %262, %cst_103 {dimension_numbers = #tpu.dot_dimension_numbers<[1], [0], [0], [1], [0, 0, 1, 1], [], []>} : vector<8x8xf32>, vector<8x16xf32>, vector<8x16xf32> -> vector<8x16xf32>
    %278 = tpu.concatenate %259, %277 in 1 : vector<8x16xf32>, vector<8x16xf32> -> vector<8x32xf32>
    %279 = tpu.concatenate %241, %278 in 0 : vector<8x32xf32>, vector<8x32xf32> -> vector<16x32xf32>
    %c1_104 = arith.constant 1 : index
    %c0_105 = arith.constant 0 : index
    %c0_106 = arith.constant 0 : index
    %280 = vector.load %arg6[%c1_104, %c0_105, %c0_106] : memref<2x32x32xf32, #tpu.memory_space<vmem>>, vector<1x32x32xf32>
    %281 = vector.shape_cast %280 : vector<1x32x32xf32> to vector<32x32xf32>
    %cst_107 = arith.constant dense<0.000000e+00> : vector<16x32xf32>
    %282 = tpu.matmul %279, %281, %cst_107 {dimension_numbers = #tpu.dot_dimension_numbers<[1], [0], [0], [1], [0, 0, 1, 1], [], []>} : vector<16x32xf32>, vector<32x32xf32>, vector<16x32xf32> -> vector<16x32xf32>
    %c1_108 = arith.constant 1 : index
    %c0_109 = arith.constant 0 : index
    %c0_110 = arith.constant 0 : index
    %283 = vector.load %arg7[%c1_108, %c0_109, %c0_110] : memref<2x1x32xf32, #tpu.memory_space<vmem>>, vector<1x1x32xf32>
    %284 = vector.shape_cast %283 : vector<1x1x32xf32> to vector<1x32xf32>
    %285 = vector.broadcast %284 : vector<1x32xf32> to vector<16x32xf32>
    %286 = arith.addf %282, %285 : vector<16x32xf32>
    %287 = arith.addf %197, %286 : vector<16x32xf32>
    %c1_111 = arith.constant 1 : index
    %c0_112 = arith.constant 0 : index
    %c0_113 = arith.constant 0 : index
    %288 = vector.load %arg8[%c1_111, %c0_112, %c0_113] : memref<2x1x32xf32, #tpu.memory_space<vmem>>, vector<1x1x32xf32>
    %289 = vector.shape_cast %288 : vector<1x1x32xf32> to vector<1x32xf32>
    %c1_114 = arith.constant 1 : index
    %c0_115 = arith.constant 0 : index
    %c0_116 = arith.constant 0 : index
    %290 = vector.load %arg9[%c1_114, %c0_115, %c0_116] : memref<2x1x32xf32, #tpu.memory_space<vmem>>, vector<1x1x32xf32>
    %291 = vector.shape_cast %290 : vector<1x1x32xf32> to vector<1x32xf32>
    %cst_117 = arith.constant dense<0.000000e+00> : vector<16xf32>
    %292 = vector.multi_reduction <add>, %287, %cst_117 [1] : vector<16x32xf32> to vector<16xf32>
    %293 = vector.shape_cast %292 : vector<16xf32> to vector<16x1xf32>
    %cst_118 = arith.constant 3.200000e+01 : f32
    %294 = vector.broadcast %cst_118 : f32 to vector<16x1xf32>
    %295 = arith.divf %293, %294 : vector<16x1xf32>
    %296 = vector.broadcast %295 : vector<16x1xf32> to vector<16x32xf32>
    %297 = arith.subf %287, %296 : vector<16x32xf32>
    %298 = arith.mulf %297, %297 : vector<16x32xf32>
    %cst_119 = arith.constant dense<0.000000e+00> : vector<16xf32>
    %299 = vector.multi_reduction <add>, %298, %cst_119 [1] : vector<16x32xf32> to vector<16xf32>
    %300 = vector.shape_cast %299 : vector<16xf32> to vector<16x1xf32>
    %cst_120 = arith.constant 3.200000e+01 : f32
    %301 = vector.broadcast %cst_120 : f32 to vector<16x1xf32>
    %302 = arith.divf %300, %301 : vector<16x1xf32>
    %303 = vector.broadcast %295 : vector<16x1xf32> to vector<16x32xf32>
    %304 = arith.subf %287, %303 : vector<16x32xf32>
    %cst_121 = arith.constant 9.99999996E-13 : f32
    %305 = vector.broadcast %cst_121 : f32 to vector<16x1xf32>
    %306 = arith.addf %302, %305 : vector<16x1xf32>
    %307 = math.rsqrt %306 : vector<16x1xf32>
    %308 = vector.broadcast %307 : vector<16x1xf32> to vector<16x32xf32>
    %309 = arith.mulf %304, %308 : vector<16x32xf32>
    %310 = vector.broadcast %289 : vector<1x32xf32> to vector<16x32xf32>
    %311 = arith.mulf %309, %310 : vector<16x32xf32>
    %312 = vector.broadcast %291 : vector<1x32xf32> to vector<16x32xf32>
    %313 = arith.addf %311, %312 : vector<16x32xf32>
    %c1_122 = arith.constant 1 : index
    %c0_123 = arith.constant 0 : index
    %c0_124 = arith.constant 0 : index
    %314 = vector.load %arg10[%c1_122, %c0_123, %c0_124] : memref<2x32x64xf32, #tpu.memory_space<vmem>>, vector<1x32x64xf32>
    %315 = vector.shape_cast %314 : vector<1x32x64xf32> to vector<32x64xf32>
    %cst_125 = arith.constant dense<0.000000e+00> : vector<16x64xf32>
    %316 = tpu.matmul %313, %315, %cst_125 {dimension_numbers = #tpu.dot_dimension_numbers<[1], [0], [0], [1], [0, 0, 1, 1], [], []>} : vector<16x32xf32>, vector<32x64xf32>, vector<16x64xf32> -> vector<16x64xf32>
    %c1_126 = arith.constant 1 : index
    %c0_127 = arith.constant 0 : index
    %c0_128 = arith.constant 0 : index
    %317 = vector.load %arg11[%c1_126, %c0_127, %c0_128] : memref<2x1x64xf32, #tpu.memory_space<vmem>>, vector<1x1x64xf32>
    %318 = vector.shape_cast %317 : vector<1x1x64xf32> to vector<1x64xf32>
    %319 = vector.broadcast %318 : vector<1x64xf32> to vector<16x64xf32>
    %320 = arith.addf %316, %319 : vector<16x64xf32>
    %321 = arith.mulf %320, %320 : vector<16x64xf32>
    %322 = arith.mulf %320, %321 : vector<16x64xf32>
    %cst_129 = arith.constant 4.471500e-02 : f32
    %323 = vector.broadcast %cst_129 : f32 to vector<16x64xf32>
    %324 = arith.mulf %323, %322 : vector<16x64xf32>
    %325 = arith.addf %320, %324 : vector<16x64xf32>
    %cst_130 = arith.constant 0.797884583 : f32
    %326 = vector.broadcast %cst_130 : f32 to vector<16x64xf32>
    %327 = arith.mulf %326, %325 : vector<16x64xf32>
    %328 = math.tanh %327 : vector<16x64xf32>
    %cst_131 = arith.constant 1.000000e+00 : f32
    %329 = vector.broadcast %cst_131 : f32 to vector<16x64xf32>
    %330 = arith.addf %329, %328 : vector<16x64xf32>
    %cst_132 = arith.constant 5.000000e-01 : f32
    %331 = vector.broadcast %cst_132 : f32 to vector<16x64xf32>
    %332 = arith.mulf %331, %330 : vector<16x64xf32>
    %333 = arith.mulf %320, %332 : vector<16x64xf32>
    %c1_133 = arith.constant 1 : index
    %c0_134 = arith.constant 0 : index
    %c0_135 = arith.constant 0 : index
    %334 = vector.load %arg12[%c1_133, %c0_134, %c0_135] : memref<2x64x32xf32, #tpu.memory_space<vmem>>, vector<1x64x32xf32>
    %335 = vector.shape_cast %334 : vector<1x64x32xf32> to vector<64x32xf32>
    %cst_136 = arith.constant dense<0.000000e+00> : vector<16x32xf32>
    %336 = tpu.matmul %333, %335, %cst_136 {dimension_numbers = #tpu.dot_dimension_numbers<[1], [0], [0], [1], [0, 0, 1, 1], [], []>} : vector<16x64xf32>, vector<64x32xf32>, vector<16x32xf32> -> vector<16x32xf32>
    %c1_137 = arith.constant 1 : index
    %c0_138 = arith.constant 0 : index
    %c0_139 = arith.constant 0 : index
    %337 = vector.load %arg13[%c1_137, %c0_138, %c0_139] : memref<2x1x32xf32, #tpu.memory_space<vmem>>, vector<1x1x32xf32>
    %338 = vector.shape_cast %337 : vector<1x1x32xf32> to vector<1x32xf32>
    %339 = vector.broadcast %338 : vector<1x32xf32> to vector<16x32xf32>
    %340 = arith.addf %336, %339 : vector<16x32xf32>
    %341 = arith.addf %313, %340 : vector<16x32xf32>
    %c1_140 = arith.constant 1 : index
    %c0_141 = arith.constant 0 : index
    %c0_142 = arith.constant 0 : index
    %342 = vector.load %arg14[%c1_140, %c0_141, %c0_142] : memref<2x1x32xf32, #tpu.memory_space<vmem>>, vector<1x1x32xf32>
    %343 = vector.shape_cast %342 : vector<1x1x32xf32> to vector<1x32xf32>
    %c1_143 = arith.constant 1 : index
    %c0_144 = arith.constant 0 : index
    %c0_145 = arith.constant 0 : index
    %344 = vector.load %arg15[%c1_143, %c0_144, %c0_145] : memref<2x1x32xf32, #tpu.memory_space<vmem>>, vector<1x1x32xf32>
    %345 = vector.shape_cast %344 : vector<1x1x32xf32> to vector<1x32xf32>
    %cst_146 = arith.constant dense<0.000000e+00> : vector<16xf32>
    %346 = vector.multi_reduction <add>, %341, %cst_146 [1] : vector<16x32xf32> to vector<16xf32>
    %347 = vector.shape_cast %346 : vector<16xf32> to vector<16x1xf32>
    %cst_147 = arith.constant 3.200000e+01 : f32
    %348 = vector.broadcast %cst_147 : f32 to vector<16x1xf32>
    %349 = arith.divf %347, %348 : vector<16x1xf32>
    %350 = vector.broadcast %349 : vector<16x1xf32> to vector<16x32xf32>
    %351 = arith.subf %341, %350 : vector<16x32xf32>
    %352 = arith.mulf %351, %351 : vector<16x32xf32>
    %cst_148 = arith.constant dense<0.000000e+00> : vector<16xf32>
    %353 = vector.multi_reduction <add>, %352, %cst_148 [1] : vector<16x32xf32> to vector<16xf32>
    %354 = vector.shape_cast %353 : vector<16xf32> to vector<16x1xf32>
    %cst_149 = arith.constant 3.200000e+01 : f32
    %355 = vector.broadcast %cst_149 : f32 to vector<16x1xf32>
    %356 = arith.divf %354, %355 : vector<16x1xf32>
    %357 = vector.broadcast %349 : vector<16x1xf32> to vector<16x32xf32>
    %358 = arith.subf %341, %357 : vector<16x32xf32>
    %cst_150 = arith.constant 9.99999996E-13 : f32
    %359 = vector.broadcast %cst_150 : f32 to vector<16x1xf32>
    %360 = arith.addf %356, %359 : vector<16x1xf32>
    %361 = math.rsqrt %360 : vector<16x1xf32>
    %362 = vector.broadcast %361 : vector<16x1xf32> to vector<16x32xf32>
    %363 = arith.mulf %358, %362 : vector<16x32xf32>
    %364 = vector.broadcast %343 : vector<1x32xf32> to vector<16x32xf32>
    %365 = arith.mulf %363, %364 : vector<16x32xf32>
    %366 = vector.broadcast %345 : vector<1x32xf32> to vector<16x32xf32>
    %367 = arith.addf %365, %366 : vector<16x32xf32>
    %368 = vector.extract_strided_slice %367 {offsets = [0, 0], sizes = [1, 32], strides = [1, 1]} : vector<16x32xf32> to vector<1x32xf32>
    %369 = vector.extract_strided_slice %367 {offsets = [8, 0], sizes = [1, 32], strides = [1, 1]} : vector<16x32xf32> to vector<1x32xf32>
    %370 = tpu.concatenate %368, %369 in 0 : vector<1x32xf32>, vector<1x32xf32> -> vector<2x32xf32>
    %c0_151 = arith.constant 0 : index
    %c0_152 = arith.constant 0 : index
    %c0_153 = arith.constant 0 : index
    %371 = vector.load %arg16[%c0_151, %c0_152, %c0_153] : memref<1x2x32xf32, #tpu.memory_space<vmem>>, vector<1x2x32xf32>
    %372 = vector.shape_cast %371 : vector<1x2x32xf32> to vector<2x32xf32>
    %373 = vector.shape_cast %370 : vector<2x32xf32> to vector<1x2x32xf32>
    tpu.vector_store %arg16[%c0_151, %c0_152, %c0_153], %373 {strides = array<i32>} : memref<1x2x32xf32, #tpu.memory_space<vmem>>, vector<1x2x32xf32>,
    return
  }
  func.func @transform_0(%arg0: i32) -> (i32, i32, i32) {
    %c0_i32 = arith.constant 0 : i32
    %c0_i32_0 = arith.constant 0 : i32
    %c0_i32_1 = arith.constant 0 : i32
    return %arg0, %c0_i32, %c0_i32_0 : i32, i32, i32
  }
  func.func @transform_1(%arg0: i32) -> (i32, i32) {
    %c0_i32 = arith.constant 0 : i32
    %c0_i32_0 = arith.constant 0 : i32
    %c0_i32_1 = arith.constant 0 : i32
    return %c0_i32, %c0_i32_0 : i32, i32
  }
  func.func @transform_2(%arg0: i32) -> (i32, i32) {
    %c0_i32 = arith.constant 0 : i32
    %c0_i32_0 = arith.constant 0 : i32
    %c0_i32_1 = arith.constant 0 : i32
    return %c0_i32, %c0_i32_0 : i32, i32
  }
  func.func @transform_3(%arg0: i32) -> (i32, i32, i32) {
    %c0_i32 = arith.constant 0 : i32
    %c0_i32_0 = arith.constant 0 : i32
    %c0_i32_1 = arith.constant 0 : i32
    %c0_i32_2 = arith.constant 0 : i32
    return %c0_i32, %c0_i32_0, %c0_i32_1 : i32, i32, i32
  }
  func.func @transform_4(%arg0: i32) -> (i32, i32, i32) {
    %c0_i32 = arith.constant 0 : i32
    %c0_i32_0 = arith.constant 0 : i32
    %c0_i32_1 = arith.constant 0 : i32
    %c0_i32_2 = arith.constant 0 : i32
    return %c0_i32, %c0_i32_0, %c0_i32_1 : i32, i32, i32
  }
  func.func @transform_5(%arg0: i32) -> (i32, i32, i32) {
    %c0_i32 = arith.constant 0 : i32
    %c0_i32_0 = arith.constant 0 : i32
    %c0_i32_1 = arith.constant 0 : i32
    %c0_i32_2 = arith.constant 0 : i32
    return %c0_i32, %c0_i32_0, %c0_i32_1 : i32, i32, i32
  }
  func.func @transform_6(%arg0: i32) -> (i32, i32, i32) {
    %c0_i32 = arith.constant 0 : i32
    %c0_i32_0 = arith.constant 0 : i32
    %c0_i32_1 = arith.constant 0 : i32
    %c0_i32_2 = arith.constant 0 : i32
    return %c0_i32, %c0_i32_0, %c0_i32_1 : i32, i32, i32
  }
  func.func @transform_7(%arg0: i32) -> (i32, i32, i32) {
    %c0_i32 = arith.constant 0 : i32
    %c0_i32_0 = arith.constant 0 : i32
    %c0_i32_1 = arith.constant 0 : i32
    %c0_i32_2 = arith.constant 0 : i32
    return %c0_i32, %c0_i32_0, %c0_i32_1 : i32, i32, i32
  }
  func.func @transform_8(%arg0: i32) -> (i32, i32, i32) {
    %c0_i32 = arith.constant 0 : i32
    %c0_i32_0 = arith.constant 0 : i32
    %c0_i32_1 = arith.constant 0 : i32
    %c0_i32_2 = arith.constant 0 : i32
    return %c0_i32, %c0_i32_0, %c0_i32_1 : i32, i32, i32
  }
  func.func @transform_9(%arg0: i32) -> (i32, i32, i32) {
    %c0_i32 = arith.constant 0 : i32
    %c0_i32_0 = arith.constant 0 : i32
    %c0_i32_1 = arith.constant 0 : i32
    %c0_i32_2 = arith.constant 0 : i32
    return %c0_i32, %c0_i32_0, %c0_i32_1 : i32, i32, i32
  }
  func.func @transform_10(%arg0: i32) -> (i32, i32, i32) {
    %c0_i32 = arith.constant 0 : i32
    %c0_i32_0 = arith.constant 0 : i32
    %c0_i32_1 = arith.constant 0 : i32
    %c0_i32_2 = arith.constant 0 : i32
    return %c0_i32, %c0_i32_0, %c0_i32_1 : i32, i32, i32
  }
  func.func @transform_11(%arg0: i32) -> (i32, i32, i32) {
    %c0_i32 = arith.constant 0 : i32
    %c0_i32_0 = arith.constant 0 : i32
    %c0_i32_1 = arith.constant 0 : i32
    %c0_i32_2 = arith.constant 0 : i32
    return %c0_i32, %c0_i32_0, %c0_i32_1 : i32, i32, i32
  }
  func.func @transform_12(%arg0: i32) -> (i32, i32, i32) {
    %c0_i32 = arith.constant 0 : i32
    %c0_i32_0 = arith.constant 0 : i32
    %c0_i32_1 = arith.constant 0 : i32
    %c0_i32_2 = arith.constant 0 : i32
    return %c0_i32, %c0_i32_0, %c0_i32_1 : i32, i32, i32
  }
  func.func @transform_13(%arg0: i32) -> (i32, i32, i32) {
    %c0_i32 = arith.constant 0 : i32
    %c0_i32_0 = arith.constant 0 : i32
    %c0_i32_1 = arith.constant 0 : i32
    %c0_i32_2 = arith.constant 0 : i32
    return %c0_i32, %c0_i32_0, %c0_i32_1 : i32, i32, i32
  }
  func.func @transform_14(%arg0: i32) -> (i32, i32, i32) {
    %c0_i32 = arith.constant 0 : i32
    %c0_i32_0 = arith.constant 0 : i32
    %c0_i32_1 = arith.constant 0 : i32
    %c0_i32_2 = arith.constant 0 : i32
    return %c0_i32, %c0_i32_0, %c0_i32_1 : i32, i32, i32
  }
  func.func @transform_15(%arg0: i32) -> (i32, i32, i32) {
    %c0_i32 = arith.constant 0 : i32
    %c0_i32_0 = arith.constant 0 : i32
    %c0_i32_1 = arith.constant 0 : i32
    return %arg0, %c0_i32, %c0_i32_0 : i32, i32, i32
  }
}

</mosaic_0001>

<bundles_post_ra>
// kernel: content_similarity_loss.3
= control target key start
LH: loop header
LB: loop body
LE: loop exit
PB: predicated region body
PF: predicated region fallthrough
CT: control target
= control target key end

     0   :  { %vm13_vm0 = vcmask 254976   ;;  %s113_s0 = inlined_call_operand.vmem [shape: f32[2,2,32], index: 0, kind: input, shape index: {}]   ;;  %s114_s1 = inlined_call_operand.hbm [shape: f32[1,1], index: 1, kind: output, shape index: {}]  }
   0x1   :  { %v9_v0 = vld [vmem:[%s113_s0] sm:$0x3]  ;;  %v73_v1 = vld [vmem:[%s113_s0 + $0x2] sm:$0x3] }
   0x2   :  { %v17_v2 = vmul.f32 %v9_v0, %v9_v0  ;;  %v29_v3 = vmul.f32 %v73_v1, %v73_v1  ;;  %v12_v4 = vmul.f32 %v73_v1, %v9_v0 }
   0x3   :  { %6 = vsyncpa [#allocation3], 0  ;;  %vm46_vm5 = vcmask 1024   ;;  %s93_s11 = smov [#allocation2]  }
   0x4   :  { %v18_v5 = vsel %vm13_vm0, %v17_v2, 0.0  ;;  %v14_v6 = vsel %vm13_vm0, %v12_v4, 0.0  ;;  %v30_v7 = vsel %vm13_vm0, %v29_v3, 0.0 }
   0x5   :  { %19 = vadd.xlane.f32.xlu0 %v18_v5  ;;  %15 = vadd.xlane.f32.xlu1 %v14_v6 }
   0x9   :  { %31 = vadd.xlane.f32.xlu0 %v30_v7 }
  0x8e   :  { %v20_v8 = vpop.xlane.xlu0 %19  ;;  %v16_v23 = vpop.xlane.xlu1 %15 }
  0x8f   :  { %77 = vrsqrt.f32 %v20_v8  ;;  %vm23_vm1 = vcmp.eq.f32.partialorder %v20_v8, inf  ;;  %v26_v14 = vand.u32 2147483648, %v20_v8  ;;  %vm25_vm2 = vcmp.eq.f32.partialorder %v20_v8, 0.0 }
  0x92   :  { %v32_v9 = vpop.xlane.xlu0 %31 }
  0x93   :  { %79 = vrsqrt.f32 %v32_v9  ;;  %vm35_vm3 = vcmp.eq.f32.partialorder %v32_v9, inf  ;;  %v38_v17 = vand.u32 2147483648, %v32_v9  ;;  %vm37_vm4 = vcmp.eq.f32.partialorder %v32_v9, 0.0 }
  0x9c   :  { %v78_v10 = vpop.eup %77 }
  0x9d   :  { %v22_v11 = vmul.f32 %v78_v10, %v20_v8 }
  0x9f   :  { %v24_v12 = vsel %vm23_vm1, %v20_v8, %v22_v11 }
  0xa0   :  { %v80_v13 = vpop.eup %79  ;;  %v27_v16 = vsel %vm25_vm2, %v26_v14, %v24_v12 }
  0xa1   :  { %v34_v15 = vmul.f32 %v80_v13, %v32_v9  ;;  %v28_v20 = vmax.f32 %v27_v16, 1e-08 }
  0xa3   :  { %v36_v18 = vsel %vm35_vm3, %v32_v9, %v34_v15 }
  0xa4   :  { %v39_v19 = vsel %vm37_vm4, %v38_v17, %v36_v18 }
  0xa5   :  { %v40_v21 = vmax.f32 %v39_v19, 1e-08 }
  0xa7   :  { %v41_v22 = vmul.f32 %v40_v21, %v28_v20 }
  0xa9   :  { %81 = vrcp.f32 %v41_v22 }
  0xb6   :  { %v82_v24 = vpop.eup %81 }
  0xb7   :  { %v43_v25 = vmul.f32 %v82_v24, %v16_v23 }
  0xb9   :  { %v44_v26 = vsub.f32 1.0, %v43_v25 }
  0xbb   :  { %v45_v27 = vmul.f32 0.5, %v44_v26 }
  0xbd   :  { %v47_v28 = vsel %vm46_vm5, %v45_v27, 0.0 }
  0xbe   :  { %48 = vadd.xlane.f32.xlu1 %v47_v28 }
 0x147   :  { %v49_v29 = vpop.xlane.xlu1 %48 }
 0x148   :  { %v50_v30 = vrot.slane %v49_v29, 4 }
 0x14a   :  { %v51_v31 = vadd.f32 %v50_v30, %v49_v29 }
 0x14c   :  { %v52_v32 = vrot.slane %v51_v31, 2 }
 0x14e   :  { %v53_v33 = vadd.f32 %v52_v32, %v51_v31 }
 0x150   :  { %v54_v34 = vrot.slane %v53_v33, 1 }
 0x152   :  { %v55_v35 = vadd.f32 %v54_v34, %v53_v33 }
 0x154   :  { %74 = vpush %v55_v35 }
 0x185   :  { %s75_s0 = spop %74 }
 0x186   :  { %s57_s10 = smul.f32 0.5, %s75_s0 }
 0x188   :  { %59 = sst [smem:[#allocation2]] %s57_s10 }
 0x189   :  { %67 = dma.smem_to_hbm %s93_s11, 16, %s114_s1, [#allocation3]  }
 0x18a   :  { %91 = dma.done.wait [#allocation3], 16  }
 0x18b   :  { %92 = vsyncadd [#allocation3], 4294967280 }
 0x18c   :  { %71 = sfence }
 0x18d   :  { %72 = vsyncpa [#allocation3], 1 }

// kernel: content_similarity_loss.2
= control target key start
LH: loop header
LB: loop body
LE: loop exit
PB: predicated region body
PF: predicated region fallthrough
CT: control target
= control target key end

     0   :  { %s3465_s18 = smov 0   ;;  %s3868_s0 = inlined_call_operand.vmem [shape: f32[2,16,32], index: 0, kind: input, shape index: {}]   ;;  %s3869_s1 = inlined_call_operand.vmem [shape: f32[1,32], index: 1, kind: input, shape index: {}]   ;;  %s3870_s2 = inlined_call_operand.vmem [shape: f32[1,32], index: 2, kind: input, shape index: {}]   ;;  %s3871_s3 = inlined_call_operand.vmem [shape: f32[2,32,128], index: 3, kind: input, shape index: {}]   ;;  %s3872_s4 = inlined_call_operand.vmem [shape: f32[2,1,128], index: 4, kind: input, shape index: {}]   ;;  %s3873_s5 = inlined_call_operand.vmem [shape: f32[2,32,32], index: 5, kind: input, shape index: {}]   ;;  %s3874_s6 = inlined_call_operand.vmem [shape: f32[2,1,32], index: 6, kind: input, shape index: {}]   ;;  %s3875_s7 = inlined_call_operand.vmem [shape: f32[2,1,32], index: 7, kind: input, shape index: {}]   ;;  %s3876_s8 = inlined_call_operand.vmem [shape: f32[2,1,32], index: 8, kind: input, shape index: {}]   ;;  %s3877_s9 = inlined_call_operand.vmem [shape: f32[2,32,64], index: 9, kind: input, shape index: {}]   ;;  %s3878_s10 = inlined_call_operand.vmem [shape: f32[2,1,64], index: 10, kind: input, shape index: {}]   ;;  %s3879_s11 = inlined_call_operand.vmem [shape: f32[2,64,32], index: 11, kind: input, shape index: {}]   ;;  %s3880_s12 = inlined_call_operand.vmem [shape: f32[2,1,32], index: 12, kind: input, shape index: {}]   ;;  %s3881_s13 = inlined_call_operand.vmem [shape: f32[2,1,32], index: 13, kind: input, shape index: {}]   ;;  %s3882_s14 = inlined_call_operand.vmem [shape: f32[2,1,32], index: 14, kind: input, shape index: {}]   ;;  %s3883_s15 = inlined_call_operand.vmem [shape: f32[2,2,32], index: 15, kind: output, shape index: {}]  }
   0x1 LB: > { %s2924_s19 = sadd.s32 4294967295, %s3375_s18   ;;  %p2928_p0 = scmp.ge.s32.totalorder %s3375_s18, 1  ;;  %s3375_s18 = sphi %s3465_s18, %s25_s18  }
   0x2   : > { %p437_p1 = scmp.lt.s32.totalorder %s3375_s18, 3 }
   0x4   : > { %p438_p2 = pnand %p2928_p0, %p437_p1 }
   0x5   : > { %p484_p3 = scmp.lt.s32.totalorder (!%p438_p2), %s2924_s19, 1  ;;  %s3379_s25 = smov (!%p438_p2), 80  }
   0x6   : > { %441 = sbr.rel (%p438_p2) target bundleno = 5200 (0x1450), region = 80  ;;  %s3380_s26 = smov (!%p438_p2), 96  }
   0x7   : > { %s3381_s27 = smov (!%p438_p2), 112   ;;  %s3382_s28 = smov (!%p438_p2), 48  }
   0x8   : > { %s3383_s29 = smov (!%p438_p2), 64   ;;  %s3884_s30 = smov (!%p438_p2), 16  }
   0x9   : > { %s3886_s21 = smov (!%p438_p2), 16  }
   0xb   : > { %s3888_s19 = smov (!%p484_p3, %s2924_s19), 1  ;;  %vm497_vm0 = vcmask 261120   ;;  %v544_v14 = vld [vmem:[%s3871_s3 + $0x18] sm:$0xff]  ;;  %v543_v15 = vld [vmem:[%s3871_s3 + $0x10] sm:$0xff]  ;;  %v542_v16 = vld [vmem:[%s3871_s3 + $0x8] sm:$0xff]  ;;  %v3377_v34 = vmov 0.0  }
   0xc   : > { %s3020_s20 = sshll.u32 %s3888_s19, 4  ;;  %3109 = vmatprep.subr.mxu1 %v544_v14  ;;  %v541_v17 = vld [vmem:[%s3871_s3] sm:$0xff]  ;;  %3130 = vmatprep.subr.mxu0 %v3377_v34  ;;  %vm3378_vm1 = vmmov 0   ;;  %vm636_vm2 = vcmask 130048   ;;  %vm712_vm3 = vcmask 64512   ;;  %vm1570_vm4 = vcmask 523264  }
   0xd   : > { %s488_s23 = scalar_lea.vmem %s3868_s0, %s3020_s20  ;;  %3110 = vmatpush3.msra.mxu1 %v544_v14  ;;  %v2932_v25 = vld [vmem:[%s3869_s1] ss:$0 sm:$0xff]  ;;  %3132 = vmatprep.mubr.msk.f32.mxu0 %vm3378_vm1, %v3377_v34  ;;  %vm2867_vm5 = vcmask 1040384   ;;  %vm2869_vm6 = vcmask 254976  }
   0xe   : > { %v493_v0 = vld [vmem:[%s488_s23] sm:$0xff]  ;;  %v494_v1 = vld [vmem:[%s488_s23 + $0x8] sm:$0xff]  ;;  %3111 = vmatprep.subr.mxu1 %v543_v15 }
   0xf   : > { %v498_v2 = vsel %vm497_vm0, %v493_v0, 0.0  ;;  %v501_v3 = vsel %vm497_vm0, %v494_v1, 0.0  ;;  %3112 = vmatpush3.msra.mxu1 %v543_v15  ;;  %v2933_v27 = vld [vmem:[%s3870_s2] ss:$0 sm:$0xff] }
  0x10   : > { %499 = vadd.xlane.f32.xlu0 %v498_v2  ;;  %3113 = vmatprep.subr.mxu1 %v542_v16  ;;  %v2934_v36 = vld [vmem:[%s3872_s4] ss:$0 sm:$0xff] }
  0x11   : > { %3114 = vmatpush3.msra.mxu1 %v542_v16 }
  0x12   : > { %3115 = vmatprep.subr.mxu1 %v541_v17 }
  0x13   : > { %3116 = vmatpush3.msra.mxu1 %v541_v17 }
  0x14   : > { %502 = vadd.xlane.f32.xlu0 %v501_v3  ;;  %3120 = vmatprep.subr.mxu1 %v3377_v34 }
  0x99   : > { %v500_v4 = vpop.xlane.xlu0 %499 }
  0x9a   : > { %v505_v5 = vmul.f32 0.03125, %v500_v4 }
  0x9c   : > { %v507_v6 = vsub.f32 %v493_v0, %v505_v5 }
  0x9d   : > { %v503_v7 = vpop.xlane.xlu0 %502 }
  0x9e   : > { %v506_v8 = vmul.f32 0.03125, %v503_v7  ;;  %v509_v9 = vmul.f32 %v507_v6, %v507_v6 }
  0xa0   : > { %v508_v10 = vsub.f32 %v494_v1, %v506_v8  ;;  %v511_v11 = vsel %vm497_vm0, %v509_v9, 0.0 }
  0xa1   : > { %512 = vadd.xlane.f32.xlu1 %v511_v11 }
  0xa2   : > { %v510_v12 = vmul.f32 %v508_v10, %v508_v10 }
  0xa4   : > { %v514_v13 = vsel %vm497_vm0, %v510_v12, 0.0 }
  0xa5   : > { %515 = vadd.xlane.f32.xlu1 %v514_v13 }
 0x12a   : > { %v513_v18 = vpop.xlane.xlu1 %512 }
 0x12b   : > { %v517_v19 = vmul.f32 0.03125, %v513_v18 }
 0x12d   : > { %v519_v20 = vadd.f32 1e-12, %v517_v19 }
 0x12e   : > { %v516_v21 = vpop.xlane.xlu1 %515 }
 0x12f   : > { %3309 = vrsqrt.f32 %v519_v20  ;;  %v518_v22 = vmul.f32 0.03125, %v516_v21 }
 0x131   : > { %v520_v23 = vadd.f32 1e-12, %v518_v22 }
 0x133   : > { %3311 = vrsqrt.f32 %v520_v23 }
 0x13c   : > { %v3310_v24 = vpop.eup %3309 }
 0x13d   : > { %v523_v26 = vmul.f32 %v3310_v24, %v507_v6 }
 0x13f   : > { %v531_v28 = vmul.f32 %v2932_v25, %v523_v26 }
 0x140   : > { %v3312_v29 = vpop.eup %3311 }
 0x141   : > { %v524_v30 = vmul.f32 %v3312_v29, %v508_v10  ;;  %v3501_v31 = vadd.f32 %v2933_v27, %v531_v28 }
 0x143   : > { %v532_v32 = vmul.f32 %v2932_v25, %v524_v30  ;;  %3117 = vmatprep.mubr.msk.f32.mxu1 %vm497_vm0, %v3501_v31 }
 0x145   : > { %v3505_v33 = vadd.f32 %v2933_v27, %v532_v32 }
 0x147   : > { %3118 = vmatmul.mubr.msk.f32.vlgmr.msra.gmra.mxu1 %vm497_vm0, %v3505_v33 }
 0x148   : > { %3122 = vmatprep.mubr.msk.f32.mxu1 %vm3378_vm1, %v3377_v34 }
 0x207   : > { %v3119_v35 = vpop.f32.mrf.mxu1 }
 0x208   : > { %v3524_v39 = vadd.f32 %v3119_v35, %v2934_v36 }
 0x209   : > { %v624_v37 = vpop.f32.mrf.mxu1 }
 0x20a   : > { %v3518_v38 = vadd.f32 %v2934_v36, %v624_v37  ;;  %v1310_v37 = vld [vmem:[%s3873_s5 + $0x18] sm:$0xff] }
 0x20c   : > { %802 = vrot.lane.b32.xlu1 %v3518_v38, %s3379_s25  ;;  %634 = vrot.lane.b32.xlu0 %v3518_v38, %s3380_s26 }
 0x210   : > { %800 = vrot.lane.b32.xlu1 %v3518_v38, %s3381_s27  ;;  %1138 = vrot.lane.b32.xlu0 %v3524_v39, %s3379_s25 }
 0x214   : > { %972 = vrot.lane.b32.xlu1 %v3524_v39, %s3380_s26 }
 0x218   : > { %1136 = vrot.lane.b32.xlu1 %v3524_v39, %s3381_s27 }
 0x27e   : > { %v803_v40 = vpop.permute.xlu1 %802  ;;  %v635_v41 = vpop.permute.xlu0 %634 }
 0x27f   : > { %3121 = vmatpush3.xpose.msk.msra.mxu1 %vm636_vm2, %v635_v41  ;;  %3131 = vmatpush3.xpose.msk.msra.mxu0 %vm636_vm2, %v803_v40  ;;  %v1307_v40 = vld [vmem:[%s3873_s5] sm:$0xff] }
 0x280   : > { %3140 = vmatprep.subr.mxu0 %v3377_v34  ;;  %3125 = vmatprep.subr.mxu1 %v3377_v34 }
 0x282   : > { %v801_v42 = vpop.permute.xlu1 %800  ;;  %3123 = vmatmul.mubr.msk.f32.vlgmr.msra.gmra.mxu1 %vm636_vm2, %v3518_v38  ;;  %v1139_v44 = vpop.permute.xlu0 %1138 }
 0x283   : > { %3133 = vmatmul.mubr.msk.f32.vlgmr.msra.gmra.mxu0 %vm636_vm2, %v801_v42  ;;  %3127 = vmatprep.mubr.msk.f32.mxu1 %vm3378_vm1, %v3377_v34 }
 0x284   : > { %3142 = vmatprep.mubr.msk.f32.mxu0 %vm3378_vm1, %v3377_v34 }
 0x286   : > { %v973_v43 = vpop.permute.xlu1 %972 }
 0x287   : > { %3141 = vmatpush3.xpose.msk.msra.mxu0 %vm636_vm2, %v973_v43 }
 0x288   : > { %3150 = vmatprep.subr.mxu0 %v3377_v34 }
 0x28a   : > { %3143 = vmatmul.mubr.msk.f32.vlgmr.msra.gmra.mxu0 %vm636_vm2, %v3524_v39  ;;  %v1137_v45 = vpop.permute.xlu1 %1136 }
 0x28b   : > { %3151 = vmatpush3.xpose.msk.msra.mxu0 %vm636_vm2, %v1139_v44  ;;  %3152 = vmatprep.mubr.msk.f32.mxu0 %vm3378_vm1, %v3377_v34 }
 0x28c   : > { %3160 = vmatprep.subr.mxu0 %v1310_v37 }
 0x28e   : > { %3153 = vmatmul.mubr.msk.f32.vlgmr.msra.gmra.mxu0 %vm636_vm2, %v1137_v45 }
 0x28f   : > { %3161 = vmatpush3.msra.mxu0 %v1310_v37  ;;  %v2954_v37 = vld [vmem:[%s3878_s10] ss:$0 sm:$0xff] }
 0x342   : > { %v707_v46 = vpop.f32.mrf.mxu1 }
 0x343   : > { %v711_v47 = vmul.f32 0.25, %v707_v46  ;;  %v874_v48 = vpop.f32.mrf.mxu0 }
 0x344   : > { %v878_v49 = vmul.f32 0.25, %v874_v48  ;;  %v3124_v50 = vpop.f32.mrf.mxu1 }
 0x345   : > { %v3134_v51 = vpop.f32.mrf.mxu0  ;;  %v713_v52 = vsel %vm712_vm3, %v711_v47, -inf }
 0x346   : > { %714 = vmax.xlane.f32.xlu0 %v713_v52  ;;  %v879_v53 = vsel %vm712_vm3, %v878_v49, -inf }
 0x347   : > { %880 = vmax.xlane.f32.xlu1 %v879_v53  ;;  %v2949_v53 = vld [vmem:[%s3874_s6] ss:$0 sm:$0xff] }
 0x34a   : > { %v1044_v54 = vpop.f32.mrf.mxu0 }
 0x34b   : > { %v1048_v55 = vmul.f32 0.25, %v1044_v54 }
 0x34c   : > { %v3144_v56 = vpop.f32.mrf.mxu0 }
 0x34d   : > { %v1049_v57 = vsel %vm712_vm3, %v1048_v55, -inf }
 0x34e   : > { %1050 = vmax.xlane.f32.xlu0 %v1049_v57  ;;  %v1210_v58 = vpop.f32.mrf.mxu0 }
 0x34f   : > { %v1214_v59 = vmul.f32 0.25, %v1210_v58 }
 0x350   : > { %v3154_v60 = vpop.f32.mrf.mxu0 }
 0x351   : > { %v1215_v61 = vsel %vm712_vm3, %v1214_v59, -inf }
 0x352   : > { %1216 = vmax.xlane.f32.xlu0 %v1215_v61 }
 0x3cf   : > { %v715_v62 = vpop.xlane.xlu0 %714 }
 0x3d0   : > { %v716_v63 = vsub.f32 %v711_v47, %v715_v62  ;;  %v881_v0 = vpop.xlane.xlu1 %880 }
 0x3d1   : > { %v882_v1 = vsub.f32 %v878_v49, %v881_v0 }
 0x3d2   : > { %v717_v2 = vmul.f32 1.442695, %v716_v63 }
 0x3d3   : > { %v883_v3 = vmul.f32 1.442695, %v882_v1 }
 0x3d4   : > { %3313 = vpow2.f32 %v717_v2 }
 0x3d5   : > { %3315 = vpow2.f32 %v883_v3 }
 0x3d7   : > { %v1051_v4 = vpop.xlane.xlu0 %1050 }
 0x3d8   : > { %v1052_v5 = vsub.f32 %v1048_v55, %v1051_v4 }
 0x3da   : > { %v1053_v6 = vmul.f32 1.442695, %v1052_v5 }
 0x3db   : > { %v1217_v13 = vpop.xlane.xlu0 %1216 }
 0x3dc   : > { %3317 = vpow2.f32 %v1053_v6  ;;  %v1218_v14 = vsub.f32 %v1214_v59, %v1217_v13 }
 0x3de   : > { %v1219_v15 = vmul.f32 1.442695, %v1218_v14 }
 0x3e0   : > { %3319 = vpow2.f32 %v1219_v15 }
 0x3e1   : > { %v3314_v7 = vpop.eup %3313 }
 0x3e2   : > { %v3316_v8 = vpop.eup %3315  ;;  %v719_v9 = vsel %vm712_vm3, %v3314_v7, 0.0 }
 0x3e3   : > { %720 = vadd.xlane.f32.xlu0 %v719_v9  ;;  %v885_v10 = vsel %vm712_vm3, %v3316_v8, 0.0  ;;  %v1445_v9 = vld [vmem:[%s3877_s9] sm:$0xff] }
 0x3e4   : > { %886 = vadd.xlane.f32.xlu1 %v885_v10 }
 0x3e9   : > { %v3318_v11 = vpop.eup %3317 }
 0x3ea   : > { %v1055_v12 = vsel %vm712_vm3, %v3318_v11, 0.0 }
 0x3eb   : > { %1056 = vadd.xlane.f32.xlu0 %v1055_v12 }
 0x3ed   : > { %v3320_v16 = vpop.eup %3319 }
 0x3ee   : > { %v1221_v17 = vsel %vm712_vm3, %v3320_v16, 0.0 }
 0x3f5   : > { %890 = vrot.lane.b32.xlu1 %v3518_v38, %s3382_s28 }
 0x3f9   : > { %1060 = vrot.lane.b32.xlu1 %v3524_v39, %s3383_s29 }
 0x401   : > { %724 = vrot.lane.b32.xlu0 %v3518_v38, %s3383_s29  ;;  %v1309_v38 = vld [vmem:[%s3873_s5 + $0x10] sm:$0xff] }
 0x402   : > { %3162 = vmatprep.subr.mxu0 %v1309_v38 }
 0x403   : > { %3163 = vmatpush3.msra.mxu0 %v1309_v38 }
 0x41d   : > { %1222 = vadd.xlane.f32.xlu1 %v1221_v17  ;;  %v2952_v17 = vld [vmem:[%s3875_s7] ss:$0 sm:$0xff] }
 0x42e   : > { %1226 = vrot.lane.b32.xlu1 %v3524_v39, %s3382_s28  ;;  %v1308_v39 = vld [vmem:[%s3873_s5 + $0x8] sm:$0xff] }
 0x42f   : > { %3164 = vmatprep.subr.mxu0 %v1308_v39 }
 0x430   : > { %3165 = vmatpush3.msra.mxu0 %v1308_v39 }
 0x431   : > { %3166 = vmatprep.subr.mxu0 %v1307_v40 }
 0x432   : > { %3167 = vmatpush3.msra.mxu0 %v1307_v40 }
 0x46c   : > { %v721_v18 = vpop.xlane.xlu0 %720 }
 0x46d   : > { %3321 = vrcp.f32 %v721_v18  ;;  %v887_v19 = vpop.xlane.xlu1 %886 }
 0x46e   : > { %3323 = vrcp.f32 %v887_v19  ;;  %v2953_v19 = vld [vmem:[%s3876_s8] ss:$0 sm:$0xff] }
 0x471   : > { %v891_v23 = vpop.permute.xlu1 %890 }
 0x474   : > { %v1057_v20 = vpop.xlane.xlu0 %1056 }
 0x475   : > { %3325 = vrcp.f32 %v1057_v20  ;;  %v1061_v27 = vpop.permute.xlu1 %1060 }
 0x478   : > { %v725_v21 = vpop.permute.xlu0 %724 }
 0x479   : > { %3126 = vmatpush3.msra.mxu1 %v725_v21 }
 0x47a   : > { %v3322_v22 = vpop.eup %3321  ;;  %3135 = vmatprep.subr.mxu1 %v3377_v34 }
 0x47b   : > { %v723_v24 = vmul.f32 %v3322_v22, %v3314_v7  ;;  %v3324_v25 = vpop.eup %3323  ;;  %v1447_v7 = vld [vmem:[%s3877_s9 + $0x10] sm:$0xff] }
 0x47c   : > { %v889_v26 = vmul.f32 %v3324_v25, %v3316_v8  ;;  %v1446_v8 = vld [vmem:[%s3877_s9 + $0x8] sm:$0xff] }
 0x47d   : > { %3128 = vmatmul.mubr.msk.f32.vlgmr.msra.gmra.mxu1 %vm712_vm3, %v723_v24 }
 0x47e   : > { %3136 = vmatpush3.msra.mxu1 %v891_v23  ;;  %3137 = vmatprep.mubr.msk.f32.mxu1 %vm3378_vm1, %v3377_v34 }
 0x47f   : > { %3145 = vmatprep.subr.mxu1 %v3377_v34 }
 0x481   : > { %3138 = vmatmul.mubr.msk.f32.vlgmr.msra.gmra.mxu1 %vm712_vm3, %v889_v26  ;;  %v1562_v26 = vld [vmem:[%s3879_s11 + $0x38] sm:$0xff] }
 0x482   : > { %v3326_v28 = vpop.eup %3325  ;;  %3146 = vmatpush3.msra.mxu1 %v1061_v27  ;;  %3147 = vmatprep.mubr.msk.f32.mxu1 %vm3378_vm1, %v3377_v34  ;;  %v1561_v27 = vld [vmem:[%s3879_s11 + $0x30] sm:$0xff] }
 0x483   : > { %v1059_v29 = vmul.f32 %v3326_v28, %v3318_v11  ;;  %3155 = vmatprep.subr.mxu1 %v3377_v34  ;;  %3182 = vmatprep.subr.mxu0 %v1562_v26  ;;  %v1560_v28 = vld [vmem:[%s3879_s11 + $0x28] sm:$0xff] }
 0x485   : > { %3148 = vmatmul.mubr.msk.f32.vlgmr.msra.gmra.mxu1 %vm712_vm3, %v1059_v29  ;;  %v1559_v29 = vld [vmem:[%s3879_s11 + $0x20] sm:$0xff] }
 0x486   : > { %3157 = vmatprep.mubr.msk.f32.mxu1 %vm3378_vm1, %v3377_v34 }
 0x4a6   : > { %v1223_v30 = vpop.xlane.xlu1 %1222 }
 0x4a7   : > { %3327 = vrcp.f32 %v1223_v30  ;;  %v1558_v30 = vld [vmem:[%s3879_s11 + $0x18] sm:$0xff] }
 0x4aa   : > { %v1227_v32 = vpop.permute.xlu1 %1226 }
 0x4ab   : > { %3156 = vmatpush3.msra.mxu1 %v1227_v32  ;;  %v1557_v32 = vld [vmem:[%s3879_s11 + $0x10] sm:$0xff] }
 0x4b4   : > { %v3328_v35 = vpop.eup %3327 }
 0x4b5   : > { %v1225_v36 = vmul.f32 %v3328_v35, %v3320_v16  ;;  %v1556_v35 = vld [vmem:[%s3879_s11 + $0x8] sm:$0xff] }
 0x4b7   : > { %3158 = vmatmul.mubr.msk.f32.vlgmr.msra.gmra.mxu1 %vm712_vm3, %v1225_v36  ;;  %v1555_v36 = vld [vmem:[%s3879_s11] sm:$0xff] }
 0x53d   : > { %v796_v41 = vpop.f32.mrf.mxu1 }
 0x53f   : > { %v3129_v42 = vpop.f32.mrf.mxu1 }
 0x541   : > { %v962_v43 = vpop.f32.mrf.mxu1 }
 0x542   : > { %967 = vrot.lane.b32.xlu0 %v962_v43, %s3884_s30 }
 0x543   : > { %v3139_v44 = vpop.f32.mrf.mxu1 }
 0x545   : > { %v1132_v45 = vpop.f32.mrf.mxu1 }
 0x547   : > { %v3149_v46 = vpop.f32.mrf.mxu1 }
 0x577   : > { %v1298_v47 = vpop.f32.mrf.mxu1 }
 0x578   : > { %1303 = vrot.lane.b32.xlu1 %v1298_v47, %s3884_s30 }
 0x579   : > { %v3159_v48 = vpop.f32.mrf.mxu1 }
 0x5b4   : > { %v968_v49 = vpop.permute.xlu0 %967 }
 0x5b5   : > { %v970_v50 = vsel %vm636_vm2, %v796_v41, %v968_v49 }
 0x5b6   : > { %3168 = vmatprep.mubr.msk.f32.mxu0 %vm497_vm0, %v970_v50 }
 0x5ea   : > { %v1304_v51 = vpop.permute.xlu1 %1303 }
 0x5eb   : > { %v1306_v52 = vsel %vm636_vm2, %v1132_v45, %v1304_v51 }
 0x5ec   : > { %3169 = vmatmul.mubr.msk.f32.vlgmr.msra.gmra.mxu0 %vm497_vm0, %v1306_v52 }
 0x5ed   : > { %3183 = vmatpush3.msra.mxu0 %v1562_v26 }
 0x5ee   : > { %3184 = vmatprep.subr.mxu0 %v1561_v27 }
 0x5ef   : > { %3185 = vmatpush3.msra.mxu0 %v1561_v27 }
 0x5f0   : > { %3186 = vmatprep.subr.mxu0 %v1560_v28 }
 0x5f1   : > { %3187 = vmatpush3.msra.mxu0 %v1560_v28 }
 0x5f2   : > { %3188 = vmatprep.subr.mxu0 %v1559_v29 }
 0x5f3   : > { %3189 = vmatpush3.msra.mxu0 %v1559_v29  ;;  %v2961_v29 = vld [vmem:[%s3882_s14] ss:$0 sm:$0xff] }
 0x5f4   : > { %3190 = vmatprep.subr.mxu0 %v1558_v30 }
 0x5f5   : > { %3191 = vmatpush3.msra.mxu0 %v1558_v30 }
 0x5f6   : > { %3192 = vmatprep.subr.mxu0 %v1557_v32 }
 0x5f7   : > { %3193 = vmatpush3.msra.mxu0 %v1557_v32 }
 0x5f8   : > { %3194 = vmatprep.subr.mxu0 %v1556_v35 }
 0x5f9   : > { %3195 = vmatpush3.msra.mxu0 %v1556_v35 }
 0x5fa   : > { %3196 = vmatprep.subr.mxu0 %v1555_v36 }
 0x5fb   : > { %3197 = vmatpush3.msra.mxu0 %v1555_v36 }
 0x5fc   : > { %3222 = vmatprep.subr.mxu0 %v3377_v34 }
 0x6ac   : > { %v3170_v54 = vpop.f32.mrf.mxu0 }
 0x6ad   : > { %v1396_v55 = vadd.f32 %v3170_v54, %v2949_v53 }
 0x6ae   : > { %v1390_v56 = vpop.f32.mrf.mxu0 }
 0x6af   : > { %v1391_v57 = vadd.f32 %v2949_v53, %v1390_v56  ;;  %v1400_v58 = vadd.f32 %v1396_v55, %v3505_v33 }
 0x6b1   : > { %v1406_v59 = vsel %vm497_vm0, %v1400_v58, 0.0  ;;  %v1399_v60 = vadd.f32 %v1391_v57, %v3501_v31  ;;  %v1448_v31 = vld [vmem:[%s3877_s9 + $0x18] sm:$0xff] }
 0x6b2   : > { %1407 = vadd.xlane.f32.xlu1 %v1406_v59  ;;  %3171 = vmatprep.subr.mxu1 %v1448_v31 }
 0x6b3   : > { %v1403_v61 = vsel %vm497_vm0, %v1399_v60, 0.0  ;;  %3172 = vmatpush3.msra.mxu1 %v1448_v31 }
 0x6b4   : > { %1404 = vadd.xlane.f32.xlu0 %v1403_v61  ;;  %3173 = vmatprep.subr.mxu1 %v1447_v7 }
 0x6b5   : > { %3174 = vmatpush3.msra.mxu1 %v1447_v7 }
 0x6b6   : > { %3175 = vmatprep.subr.mxu1 %v1446_v8 }
 0x6b7   : > { %3176 = vmatpush3.msra.mxu1 %v1446_v8 }
 0x6b8   : > { %3177 = vmatprep.subr.mxu1 %v1445_v9 }
 0x6b9   : > { %3178 = vmatpush3.msra.mxu1 %v1445_v9 }
 0x73b   : > { %v1408_v62 = vpop.xlane.xlu1 %1407 }
 0x73c   : > { %v1410_v63 = vmul.f32 0.03125, %v1408_v62 }
 0x73d   : > { %v1405_v0 = vpop.xlane.xlu0 %1404 }
 0x73e   : > { %v1409_v1 = vmul.f32 0.03125, %v1405_v0  ;;  %v1412_v2 = vsub.f32 %v1400_v58, %v1410_v63 }
 0x740   : > { %v1411_v3 = vsub.f32 %v1399_v60, %v1409_v1  ;;  %v1414_v6 = vmul.f32 %v1412_v2, %v1412_v2  ;;  %v2957_v60 = vld [vmem:[%s3880_s12] ss:$0 sm:$0xff] }
 0x742   : > { %v1413_v4 = vmul.f32 %v1411_v3, %v1411_v3  ;;  %v1418_v33 = vsel %vm497_vm0, %v1414_v6, 0.0 }
 0x744   : > { %v1415_v5 = vsel %vm497_vm0, %v1413_v4, 0.0 }
 0x745   : > { %1416 = vadd.xlane.f32.xlu0 %v1415_v5 }
 0x749   : > { %1419 = vadd.xlane.f32.xlu0 %v1418_v33 }
 0x7ce   : > { %v1417_v10 = vpop.xlane.xlu0 %1416 }
 0x7cf   : > { %v1421_v11 = vmul.f32 0.03125, %v1417_v10 }
 0x7d1   : > { %v1423_v12 = vadd.f32 1e-12, %v1421_v11 }
 0x7d2   : > { %v1420_v13 = vpop.xlane.xlu0 %1419 }
 0x7d3   : > { %3329 = vrsqrt.f32 %v1423_v12  ;;  %v1422_v14 = vmul.f32 0.03125, %v1420_v13  ;;  %v2965_v13 = vld [vmem:[%s3871_s3 + $0x38] sm:$0xff] }
 0x7d4   : > { %3201 = vmatprep.subr.mxu1 %v2965_v13 }
 0x7d5   : > { %v1424_v15 = vadd.f32 1e-12, %v1422_v14  ;;  %v2964_v14 = vld [vmem:[%s3871_s3 + $0x30] sm:$0xff] }
 0x7d7   : > { %3331 = vrsqrt.f32 %v1424_v15  ;;  %v2963_v15 = vld [vmem:[%s3871_s3 + $0x28] sm:$0xff] }
 0x7e0   : > { %v3330_v16 = vpop.eup %3329 }
 0x7e1   : > { %v1427_v18 = vmul.f32 %v3330_v16, %v1411_v3  ;;  %v2962_v16 = vld [vmem:[%s3871_s3 + $0x20] sm:$0xff] }
 0x7e3   : > { %v1435_v20 = vmul.f32 %v2952_v17, %v1427_v18 }
 0x7e4   : > { %v3332_v21 = vpop.eup %3331 }
 0x7e5   : > { %v1428_v22 = vmul.f32 %v3332_v21, %v1412_v2  ;;  %v3627_v23 = vadd.f32 %v2953_v19, %v1435_v20 }
 0x7e7   : > { %v1436_v24 = vmul.f32 %v2952_v17, %v1428_v22  ;;  %3179 = vmatprep.mubr.msk.f32.mxu1 %vm497_vm0, %v3627_v23 }
 0x7e9   : > { %v1444_v25 = vadd.f32 %v2953_v19, %v1436_v24  ;;  %v2960_v24 = vld [vmem:[%s3881_s13] ss:$0 sm:$0xff] }
 0x7eb   : > { %3180 = vmatmul.mubr.msk.f32.vlgmr.msra.gmra.mxu1 %vm497_vm0, %v1444_v25 }
 0x7ec   : > { %3202 = vmatpush3.msra.mxu1 %v2965_v13 }
 0x7ed   : > { %3203 = vmatprep.subr.mxu1 %v2964_v14 }
 0x7ee   : > { %3204 = vmatpush3.msra.mxu1 %v2964_v14 }
 0x7ef   : > { %3205 = vmatprep.subr.mxu1 %v2963_v15 }
 0x7f0   : > { %3206 = vmatpush3.msra.mxu1 %v2963_v15 }
 0x7f1   : > { %3207 = vmatprep.subr.mxu1 %v2962_v16 }
 0x7f2   : > { %3208 = vmatpush3.msra.mxu1 %v2962_v16 }
 0x7f3   : > { %3212 = vmatprep.subr.mxu1 %v3377_v34 }
 0x8ab   : > { %v3181_v38 = vpop.f32.mrf.mxu1 }
 0x8ac   : > { %v1534_v39 = vadd.f32 %v3181_v38, %v2954_v37 }
 0x8ad   : > { %v1528_v40 = vpop.f32.mrf.mxu1 }
 0x8ae   : > { %v1538_v41 = vmul.f32 %v1534_v39, %v1534_v39  ;;  %v1529_v42 = vadd.f32 %v2954_v37, %v1528_v40  ;;  %v2967_v37 = vld [vmem:[%s3872_s4 + $0x1] ss:$0 sm:$0xff] }
 0x8b0   : > { %v1540_v43 = vmul.f32 %v1538_v41, %v1534_v39  ;;  %v1537_v44 = vmul.f32 %v1529_v42, %v1529_v42 }
 0x8b2   : > { %v1542_v45 = vmul.f32 0.044715, %v1540_v43  ;;  %v1539_v46 = vmul.f32 %v1537_v44, %v1529_v42 }
 0x8b4   : > { %v1544_v47 = vadd.f32 %v1542_v45, %v1534_v39  ;;  %v1541_v48 = vmul.f32 0.044715, %v1539_v46 }
 0x8b6   : > { %v1546_v49 = vmul.f32 0.7978846, %v1544_v47  ;;  %v1543_v50 = vadd.f32 %v1541_v48, %v1529_v42 }
 0x8b8   : > { %3333 = vtanh.f32 %v1546_v49  ;;  %v1545_v51 = vmul.f32 0.7978846, %v1543_v50 }
 0x8ba   : > { %3335 = vtanh.f32 %v1545_v51 }
 0x8c5   : > { %v3334_v52 = vpop.eup %3333 }
 0x8c6   : > { %v1550_v53 = vadd.f32 1.0, %v3334_v52 }
 0x8c7   : > { %v3336_v54 = vpop.eup %3335 }
 0x8c8   : > { %v1549_v55 = vadd.f32 1.0, %v3336_v54  ;;  %v1552_v56 = vmul.f32 0.5, %v1550_v53 }
 0x8ca   : > { %v1551_v57 = vmul.f32 0.5, %v1549_v55  ;;  %v1554_v59 = vmul.f32 %v1552_v56, %v1534_v39 }
 0x8cc   : > { %v1553_v58 = vmul.f32 %v1551_v57, %v1529_v42 }
 0x8ce   : > { %3198 = vmatprep.mubr.msk.f32.mxu0 %vm1570_vm4, %v1553_v58 }
 0x8cf   : > { %3199 = vmatmul.mubr.msk.f32.vlgmr.msra.gmra.mxu0 %vm1570_vm4, %v1554_v59 }
 0x8d0   : > { %3224 = vmatprep.mubr.msk.f32.mxu0 %vm3378_vm1, %v3377_v34 }
 0x98f   : > { %v3200_v61 = vpop.f32.mrf.mxu0 }
 0x990   : > { %v1649_v62 = vadd.f32 %v3200_v61, %v2957_v60 }
 0x991   : > { %v1643_v63 = vpop.f32.mrf.mxu0 }
 0x992   : > { %v1644_v0 = vadd.f32 %v2957_v60, %v1643_v63  ;;  %v1653_v1 = vadd.f32 %v1649_v62, %v1444_v25 }
 0x994   : > { %v1659_v2 = vsel %vm497_vm0, %v1653_v1, 0.0  ;;  %v1652_v3 = vadd.f32 %v1644_v0, %v3627_v23 }
 0x995   : > { %1660 = vadd.xlane.f32.xlu1 %v1659_v2 }
 0x996   : > { %v1656_v4 = vsel %vm497_vm0, %v1652_v3, 0.0 }
 0x997   : > { %1657 = vadd.xlane.f32.xlu0 %v1656_v4 }
 0xa1e   : > { %v1661_v5 = vpop.xlane.xlu1 %1660 }
 0xa1f   : > { %v1663_v6 = vmul.f32 0.03125, %v1661_v5 }
 0xa20   : > { %v1658_v33 = vpop.xlane.xlu0 %1657 }
 0xa21   : > { %v1665_v31 = vsub.f32 %v1653_v1, %v1663_v6  ;;  %v1662_v7 = vmul.f32 0.03125, %v1658_v33 }
 0xa23   : > { %v1664_v8 = vsub.f32 %v1652_v3, %v1662_v7  ;;  %v1667_v9 = vmul.f32 %v1665_v31, %v1665_v31 }
 0xa25   : > { %v1671_v10 = vsel %vm497_vm0, %v1667_v9, 0.0  ;;  %v1666_v11 = vmul.f32 %v1664_v8, %v1664_v8 }
 0xa26   : > { %1672 = vadd.xlane.f32.xlu1 %v1671_v10 }
 0xa27   : > { %v1668_v12 = vsel %vm497_vm0, %v1666_v11, 0.0 }
 0xa28   : > { %1669 = vadd.xlane.f32.xlu0 %v1668_v12 }
 0xaaf   : > { %v1673_v17 = vpop.xlane.xlu1 %1672 }
 0xab0   : > { %v1675_v18 = vmul.f32 0.03125, %v1673_v17 }
 0xab1   : > { %v1670_v19 = vpop.xlane.xlu0 %1669 }
 0xab2   : > { %v1677_v20 = vadd.f32 1e-12, %v1675_v18  ;;  %v1674_v21 = vmul.f32 0.03125, %v1670_v19 }
 0xab4   : > { %3337 = vrsqrt.f32 %v1677_v20  ;;  %v1676_v22 = vadd.f32 1e-12, %v1674_v21 }
 0xab6   : > { %3339 = vrsqrt.f32 %v1676_v22 }
 0xac1   : > { %v3338_v23 = vpop.eup %3337 }
 0xac2   : > { %v1681_v25 = vmul.f32 %v3338_v23, %v1665_v31 }
 0xac3   : > { %v3340_v26 = vpop.eup %3339 }
 0xac4   : > { %v1680_v27 = vmul.f32 %v3340_v26, %v1664_v8  ;;  %v1689_v28 = vmul.f32 %v2960_v24, %v1681_v25 }
 0xac6   : > { %v1688_v30 = vmul.f32 %v2960_v24, %v1680_v27  ;;  %v3693_v35 = vadd.f32 %v2961_v29, %v1689_v28 }
 0xac8   : > { %v3691_v32 = vadd.f32 %v2961_v29, %v1688_v30 }
 0xaca   : > { %3209 = vmatprep.mubr.msk.f32.mxu1 %vm497_vm0, %v3691_v32 }
 0xacb   : > { %3210 = vmatmul.mubr.msk.f32.vlgmr.msra.gmra.mxu1 %vm497_vm0, %v3693_v35 }
 0xacc   : > { %3214 = vmatprep.mubr.msk.f32.mxu1 %vm3378_vm1, %v3377_v34 }
 0xb8b   : > { %v3211_v36 = vpop.f32.mrf.mxu1 }
 0xb8c   : > { %v3710_v40 = vadd.f32 %v3211_v36, %v2967_v37 }
 0xb8d   : > { %v1783_v38 = vpop.f32.mrf.mxu1 }
 0xb8e   : > { %v3704_v39 = vadd.f32 %v2967_v37, %v1783_v38  ;;  %v2985_v38 = vld [vmem:[%s3873_s5 + $0x38] sm:$0xff] }
 0xb90   : > { %1959 = vrot.lane.b32.xlu1 %v3704_v39, %s3379_s25  ;;  %1793 = vrot.lane.b32.xlu0 %v3704_v39, %s3380_s26 }
 0xb94   : > { %1957 = vrot.lane.b32.xlu1 %v3704_v39, %s3381_s27  ;;  %2295 = vrot.lane.b32.xlu0 %v3710_v40, %s3379_s25 }
 0xb98   : > { %2129 = vrot.lane.b32.xlu1 %v3710_v40, %s3380_s26 }
 0xb9c   : > { %2293 = vrot.lane.b32.xlu1 %v3710_v40, %s3381_s27 }
 0xc02   : > { %v1960_v41 = vpop.permute.xlu1 %1959  ;;  %v1794_v42 = vpop.permute.xlu0 %1793 }
 0xc03   : > { %3213 = vmatpush3.xpose.msk.msra.mxu1 %vm636_vm2, %v1794_v42  ;;  %3223 = vmatpush3.xpose.msk.msra.mxu0 %vm636_vm2, %v1960_v41 }
 0xc04   : > { %3232 = vmatprep.subr.mxu0 %v3377_v34  ;;  %3217 = vmatprep.subr.mxu1 %v3377_v34 }
 0xc06   : > { %v1958_v43 = vpop.permute.xlu1 %1957  ;;  %3215 = vmatmul.mubr.msk.f32.vlgmr.msra.gmra.mxu1 %vm636_vm2, %v3704_v39  ;;  %v2296_v45 = vpop.permute.xlu0 %2295 }
 0xc07   : > { %3225 = vmatmul.mubr.msk.f32.vlgmr.msra.gmra.mxu0 %vm636_vm2, %v1958_v43  ;;  %3219 = vmatprep.mubr.msk.f32.mxu1 %vm3378_vm1, %v3377_v34 }
 0xc08   : > { %3234 = vmatprep.mubr.msk.f32.mxu0 %vm3378_vm1, %v3377_v34 }
 0xc0a   : > { %v2130_v44 = vpop.permute.xlu1 %2129 }
 0xc0b   : > { %3233 = vmatpush3.xpose.msk.msra.mxu0 %vm636_vm2, %v2130_v44 }
 0xc0c   : > { %3242 = vmatprep.subr.mxu0 %v3377_v34 }
 0xc0e   : > { %3235 = vmatmul.mubr.msk.f32.vlgmr.msra.gmra.mxu0 %vm636_vm2, %v3710_v40  ;;  %v2294_v46 = vpop.permute.xlu1 %2293 }
 0xc0f   : > { %3243 = vmatpush3.xpose.msk.msra.mxu0 %vm636_vm2, %v2296_v45  ;;  %3244 = vmatprep.mubr.msk.f32.mxu0 %vm3378_vm1, %v3377_v34 }
 0xc10   : > { %3252 = vmatprep.subr.mxu0 %v2985_v38 }
 0xc12   : > { %3245 = vmatmul.mubr.msk.f32.vlgmr.msra.gmra.mxu0 %vm636_vm2, %v2294_v46 }
 0xc13   : > { %3253 = vmatpush3.msra.mxu0 %v2985_v38 }
 0xcc6   : > { %v1865_v47 = vpop.f32.mrf.mxu1 }
 0xcc7   : > { %v1869_v48 = vmul.f32 0.25, %v1865_v47  ;;  %v2031_v49 = vpop.f32.mrf.mxu0 }
 0xcc8   : > { %v2035_v50 = vmul.f32 0.25, %v2031_v49  ;;  %v3216_v51 = vpop.f32.mrf.mxu1 }
 0xcc9   : > { %v3226_v52 = vpop.f32.mrf.mxu0  ;;  %v1870_v53 = vsel %vm712_vm3, %v1869_v48, -inf }
 0xcca   : > { %1871 = vmax.xlane.f32.xlu0 %v1870_v53  ;;  %v2036_v54 = vsel %vm712_vm3, %v2035_v50, -inf  ;;  %v2987_v53 = vld [vmem:[%s3874_s6 + $0x1] ss:$0 sm:$0xff] }
 0xccb   : > { %2037 = vmax.xlane.f32.xlu1 %v2036_v54 }
 0xcce   : > { %v2201_v55 = vpop.f32.mrf.mxu0 }
 0xccf   : > { %v2205_v56 = vmul.f32 0.25, %v2201_v55 }
 0xcd0   : > { %v3236_v57 = vpop.f32.mrf.mxu0 }
 0xcd1   : > { %v2206_v58 = vsel %vm712_vm3, %v2205_v56, -inf }
 0xcd2   : > { %2207 = vmax.xlane.f32.xlu0 %v2206_v58  ;;  %v2367_v59 = vpop.f32.mrf.mxu0 }
 0xcd3   : > { %v2371_v60 = vmul.f32 0.25, %v2367_v59 }
 0xcd4   : > { %v3246_v61 = vpop.f32.mrf.mxu0 }
 0xcd5   : > { %v2372_v62 = vsel %vm712_vm3, %v2371_v60, -inf }
 0xcd6   : > { %2373 = vmax.xlane.f32.xlu0 %v2372_v62 }
 0xd53   : > { %v1872_v63 = vpop.xlane.xlu0 %1871 }
 0xd54   : > { %v1873_v0 = vsub.f32 %v1869_v48, %v1872_v63  ;;  %v2038_v1 = vpop.xlane.xlu1 %2037 }
 0xd55   : > { %v2039_v2 = vsub.f32 %v2035_v50, %v2038_v1 }
 0xd56   : > { %v1874_v3 = vmul.f32 1.442695, %v1873_v0 }
 0xd57   : > { %v2040_v4 = vmul.f32 1.442695, %v2039_v2 }
 0xd58   : > { %3341 = vpow2.f32 %v1874_v3 }
 0xd59   : > { %3343 = vpow2.f32 %v2040_v4 }
 0xd5b   : > { %v2208_v5 = vpop.xlane.xlu0 %2207 }
 0xd5c   : > { %v2209_v6 = vsub.f32 %v2205_v56, %v2208_v5 }
 0xd5e   : > { %v2210_v33 = vmul.f32 1.442695, %v2209_v6 }
 0xd5f   : > { %v2374_v12 = vpop.xlane.xlu0 %2373 }
 0xd60   : > { %3345 = vpow2.f32 %v2210_v33  ;;  %v2375_v13 = vsub.f32 %v2371_v60, %v2374_v12  ;;  %v2996_v33 = vld [vmem:[%s3877_s9 + $0x30] sm:$0xff] }
 0xd62   : > { %v2376_v14 = vmul.f32 1.442695, %v2375_v13 }
 0xd64   : > { %3347 = vpow2.f32 %v2376_v14 }
 0xd65   : > { %v3342_v31 = vpop.eup %3341 }
 0xd66   : > { %v3344_v7 = vpop.eup %3343  ;;  %v1876_v8 = vsel %vm712_vm3, %v3342_v31, 0.0 }
 0xd67   : > { %1877 = vadd.xlane.f32.xlu0 %v1876_v8  ;;  %v2042_v9 = vsel %vm712_vm3, %v3344_v7, 0.0 }
 0xd68   : > { %2043 = vadd.xlane.f32.xlu1 %v2042_v9 }
 0xd6d   : > { %v3346_v10 = vpop.eup %3345 }
 0xd6e   : > { %v2212_v11 = vsel %vm712_vm3, %v3346_v10, 0.0 }
 0xd6f   : > { %2213 = vadd.xlane.f32.xlu0 %v2212_v11 }
 0xd71   : > { %v3348_v15 = vpop.eup %3347 }
 0xd72   : > { %v2378_v16 = vsel %vm712_vm3, %v3348_v15, 0.0 }
 0xd79   : > { %2047 = vrot.lane.b32.xlu1 %v3704_v39, %s3382_s28 }
 0xd7d   : > { %2217 = vrot.lane.b32.xlu1 %v3710_v40, %s3383_s29 }
 0xd85   : > { %1881 = vrot.lane.b32.xlu0 %v3704_v39, %s3383_s29  ;;  %v2984_v39 = vld [vmem:[%s3873_s5 + $0x30] sm:$0xff] }
 0xd86   : > { %3254 = vmatprep.subr.mxu0 %v2984_v39 }
 0xd87   : > { %3255 = vmatpush3.msra.mxu0 %v2984_v39 }
 0xda1   : > { %2379 = vadd.xlane.f32.xlu1 %v2378_v16 }
 0xdb2   : > { %2383 = vrot.lane.b32.xlu1 %v3710_v40, %s3382_s28  ;;  %v2982_v40 = vld [vmem:[%s3873_s5 + $0x20] sm:$0xff] }
 0xdf0   : > { %v1878_v17 = vpop.xlane.xlu0 %1877 }
 0xdf1   : > { %3349 = vrcp.f32 %v1878_v17  ;;  %v2044_v18 = vpop.xlane.xlu1 %2043  ;;  %v2993_v17 = vld [vmem:[%s3876_s8 + $0x1] ss:$0 sm:$0xff] }
 0xdf2   : > { %3351 = vrcp.f32 %v2044_v18 }
 0xdf5   : > { %v2048_v22 = vpop.permute.xlu1 %2047 }
 0xdf8   : > { %v2214_v19 = vpop.xlane.xlu0 %2213 }
 0xdf9   : > { %3353 = vrcp.f32 %v2214_v19  ;;  %v2218_v26 = vpop.permute.xlu1 %2217 }
 0xdfc   : > { %v1882_v20 = vpop.permute.xlu0 %1881 }
 0xdfd   : > { %3218 = vmatpush3.msra.mxu1 %v1882_v20 }
 0xdfe   : > { %v3350_v21 = vpop.eup %3349  ;;  %3227 = vmatprep.subr.mxu1 %v3377_v34 }
 0xdff   : > { %v1880_v23 = vmul.f32 %v3350_v21, %v3342_v31  ;;  %v3352_v24 = vpop.eup %3351  ;;  %v2995_v31 = vld [vmem:[%s3877_s9 + $0x28] sm:$0xff] }
 0xe00   : > { %v2046_v25 = vmul.f32 %v3352_v24, %v3344_v7  ;;  %v2994_v7 = vld [vmem:[%s3877_s9 + $0x20] sm:$0xff]  ;;  %v3009_v24 = vld [vmem:[%s3879_s11 + $0x78] sm:$0xff] }
 0xe01   : > { %3220 = vmatmul.mubr.msk.f32.vlgmr.msra.gmra.mxu1 %vm712_vm3, %v1880_v23 }
 0xe02   : > { %3228 = vmatpush3.msra.mxu1 %v2048_v22  ;;  %3229 = vmatprep.mubr.msk.f32.mxu1 %vm3378_vm1, %v3377_v34 }
 0xe03   : > { %3237 = vmatprep.subr.mxu1 %v3377_v34 }
 0xe05   : > { %3230 = vmatmul.mubr.msk.f32.vlgmr.msra.gmra.mxu1 %vm712_vm3, %v2046_v25  ;;  %v3008_v25 = vld [vmem:[%s3879_s11 + $0x70] sm:$0xff] }
 0xe06   : > { %v3354_v27 = vpop.eup %3353  ;;  %3238 = vmatpush3.msra.mxu1 %v2218_v26  ;;  %3239 = vmatprep.mubr.msk.f32.mxu1 %vm3378_vm1, %v3377_v34  ;;  %v3007_v26 = vld [vmem:[%s3879_s11 + $0x68] sm:$0xff] }
 0xe07   : > { %v2216_v28 = vmul.f32 %v3354_v27, %v3346_v10  ;;  %3247 = vmatprep.subr.mxu1 %v3377_v34  ;;  %v3006_v27 = vld [vmem:[%s3879_s11 + $0x60] sm:$0xff] }
 0xe09   : > { %3240 = vmatmul.mubr.msk.f32.vlgmr.msra.gmra.mxu1 %vm712_vm3, %v2216_v28  ;;  %v3005_v28 = vld [vmem:[%s3879_s11 + $0x58] sm:$0xff] }
 0xe0a   : > { %3249 = vmatprep.mubr.msk.f32.mxu1 %vm3378_vm1, %v3377_v34  ;;  %v2983_v34 = vld [vmem:[%s3873_s5 + $0x28] sm:$0xff] }
 0xe0b   : > { %3256 = vmatprep.subr.mxu0 %v2983_v34 }
 0xe0c   : > { %3257 = vmatpush3.msra.mxu0 %v2983_v34 }
 0xe0d   : > { %3258 = vmatprep.subr.mxu0 %v2982_v40 }
 0xe0e   : > { %3259 = vmatpush3.msra.mxu0 %v2982_v40 }
 0xe0f   : > { %3274 = vmatprep.subr.mxu0 %v3009_v24 }
 0xe2a   : > { %v2380_v29 = vpop.xlane.xlu1 %2379 }
 0xe2b   : > { %3355 = vrcp.f32 %v2380_v29  ;;  %v3004_v29 = vld [vmem:[%s3879_s11 + $0x50] sm:$0xff] }
 0xe2e   : > { %v2384_v30 = vpop.permute.xlu1 %2383 }
 0xe2f   : > { %3248 = vmatpush3.msra.mxu1 %v2384_v30  ;;  %v3003_v30 = vld [vmem:[%s3879_s11 + $0x48] sm:$0xff] }
 0xe38   : > { %v3356_v36 = vpop.eup %3355 }
 0xe39   : > { %v2382_v37 = vmul.f32 %v3356_v36, %v3348_v15  ;;  %v2992_v15 = vld [vmem:[%s3875_s7 + $0x1] ss:$0 sm:$0xff] }
 0xe3a   : > { %v3002_v36 = vld [vmem:[%s3879_s11 + $0x40] sm:$0xff] }
 0xe3b   : > { %3250 = vmatmul.mubr.msk.f32.vlgmr.msra.gmra.mxu1 %vm712_vm3, %v2382_v37  ;;  %v2999_v37 = vld [vmem:[%s3878_s10 + $0x1] ss:$0 sm:$0xff] }
 0xec1   : > { %v1953_v41 = vpop.f32.mrf.mxu1 }
 0xec3   : > { %v3221_v42 = vpop.f32.mrf.mxu1 }
 0xec5   : > { %v2119_v43 = vpop.f32.mrf.mxu1 }
 0xec6   : > { %2124 = vrot.lane.b32.xlu0 %v2119_v43, %s3886_s21 }
 0xec7   : > { %v3231_v44 = vpop.f32.mrf.mxu1 }
 0xec9   : > { %v2289_v45 = vpop.f32.mrf.mxu1 }
 0xecb   : > { %v3241_v46 = vpop.f32.mrf.mxu1 }
 0xefb   : > { %v2455_v47 = vpop.f32.mrf.mxu1 }
 0xefc   : > { %2460 = vrot.lane.b32.xlu1 %v2455_v47, %s3886_s21  ;;  %s2931_s21 = sshll.u32 %s3888_s19, 1 }
 0xefd   : > { %v3251_v48 = vpop.f32.mrf.mxu1  ;;  %s492_s30 = scalar_lea.vmem %s3883_s15, %s2931_s21 }
 0xf38   : > { %v2125_v49 = vpop.permute.xlu0 %2124 }
 0xf39   : > { %v2127_v50 = vsel %vm636_vm2, %v1953_v41, %v2125_v49 }
 0xf3a   : > { %3260 = vmatprep.mubr.msk.f32.mxu0 %vm497_vm0, %v2127_v50 }
 0xf6e   : > { %v2461_v51 = vpop.permute.xlu1 %2460 }
 0xf6f   : > { %v2463_v52 = vsel %vm636_vm2, %v2289_v45, %v2461_v51 }
 0xf70   : > { %3261 = vmatmul.mubr.msk.f32.vlgmr.msra.gmra.mxu0 %vm497_vm0, %v2463_v52 }
 0xf71   : > { %3275 = vmatpush3.msra.mxu0 %v3009_v24 }
 0xf72   : > { %3276 = vmatprep.subr.mxu0 %v3008_v25 }
 0xf73   : > { %3277 = vmatpush3.msra.mxu0 %v3008_v25 }
 0xf74   : > { %3278 = vmatprep.subr.mxu0 %v3007_v26 }
 0xf75   : > { %3279 = vmatpush3.msra.mxu0 %v3007_v26 }
 0xf76   : > { %3280 = vmatprep.subr.mxu0 %v3006_v27 }
 0xf77   : > { %3281 = vmatpush3.msra.mxu0 %v3006_v27 }
 0xf78   : > { %3282 = vmatprep.subr.mxu0 %v3005_v28 }
 0xf79   : > { %3283 = vmatpush3.msra.mxu0 %v3005_v28 }
 0xf7a   : > { %3284 = vmatprep.subr.mxu0 %v3004_v29 }
 0xf7b   : > { %3285 = vmatpush3.msra.mxu0 %v3004_v29 }
 0xf7c   : > { %3286 = vmatprep.subr.mxu0 %v3003_v30 }
 0xf7d   : > { %3287 = vmatpush3.msra.mxu0 %v3003_v30 }
 0xf7e   : > { %3288 = vmatprep.subr.mxu0 %v3002_v36 }
 0xf7f   : > { %3289 = vmatpush3.msra.mxu0 %v3002_v36 }
0x1030   : > { %v3262_v54 = vpop.f32.mrf.mxu0 }
0x1031   : > { %v2555_v55 = vadd.f32 %v3262_v54, %v2987_v53 }
0x1032   : > { %v2549_v56 = vpop.f32.mrf.mxu0 }
0x1033   : > { %v2550_v57 = vadd.f32 %v2987_v53, %v2549_v56  ;;  %v2559_v58 = vadd.f32 %v2555_v55, %v3693_v35 }
0x1035   : > { %v2567_v59 = vsel %vm497_vm0, %v2559_v58, 0.0  ;;  %v2558_v60 = vadd.f32 %v2550_v57, %v3691_v32  ;;  %v2997_v32 = vld [vmem:[%s3877_s9 + $0x38] sm:$0xff] }
0x1036   : > { %2568 = vadd.xlane.f32.xlu1 %v2567_v59  ;;  %3263 = vmatprep.subr.mxu1 %v2997_v32  ;;  %v3011_v59 = vld [vmem:[%s3880_s12 + $0x1] ss:$0 sm:$0xff] }
0x1037   : > { %v2564_v61 = vsel %vm497_vm0, %v2558_v60, 0.0  ;;  %3264 = vmatpush3.msra.mxu1 %v2997_v32 }
0x1038   : > { %2565 = vadd.xlane.f32.xlu0 %v2564_v61  ;;  %3265 = vmatprep.subr.mxu1 %v2996_v33 }
0x1039   : > { %3266 = vmatpush3.msra.mxu1 %v2996_v33 }
0x103a   : > { %3267 = vmatprep.subr.mxu1 %v2995_v31 }
0x103b   : > { %3268 = vmatpush3.msra.mxu1 %v2995_v31 }
0x103c   : > { %3269 = vmatprep.subr.mxu1 %v2994_v7 }
0x103d   : > { %3270 = vmatpush3.msra.mxu1 %v2994_v7 }
0x10bf   : > { %v2569_v62 = vpop.xlane.xlu1 %2568 }
0x10c0   : > { %v2571_v63 = vmul.f32 0.03125, %v2569_v62 }
0x10c1   : > { %v2566_v0 = vpop.xlane.xlu0 %2565 }
0x10c2   : > { %v2570_v1 = vmul.f32 0.03125, %v2566_v0  ;;  %v2573_v2 = vsub.f32 %v2559_v58, %v2571_v63 }
0x10c4   : > { %v2572_v3 = vsub.f32 %v2558_v60, %v2570_v1  ;;  %v2575_v6 = vmul.f32 %v2573_v2, %v2573_v2 }
0x10c6   : > { %v2574_v4 = vmul.f32 %v2572_v3, %v2572_v3  ;;  %v2579_v35 = vsel %vm497_vm0, %v2575_v6, 0.0 }
0x10c8   : > { %v2576_v5 = vsel %vm497_vm0, %v2574_v4, 0.0 }
0x10c9   : > { %2577 = vadd.xlane.f32.xlu0 %v2576_v5 }
0x10cd   : > { %2580 = vadd.xlane.f32.xlu0 %v2579_v35 }
0x1152   : > { %v2578_v8 = vpop.xlane.xlu0 %2577 }
0x1153   : > { %v2582_v9 = vmul.f32 0.03125, %v2578_v8 }
0x1155   : > { %v2584_v10 = vadd.f32 1e-12, %v2582_v9 }
0x1156   : > { %v2581_v11 = vpop.xlane.xlu0 %2580 }
0x1157   : > { %3357 = vrsqrt.f32 %v2584_v10  ;;  %v2583_v12 = vmul.f32 0.03125, %v2581_v11 }
0x1159   : > { %v2585_v13 = vadd.f32 1e-12, %v2583_v12 }
0x115b   : > { %3359 = vrsqrt.f32 %v2585_v13 }
0x1164   : > { %v3358_v14 = vpop.eup %3357 }
0x1165   : > { %v2588_v16 = vmul.f32 %v3358_v14, %v2572_v3 }
0x1167   : > { %v2596_v18 = vmul.f32 %v2992_v15, %v2588_v16 }
0x1168   : > { %v3360_v19 = vpop.eup %3359 }
0x1169   : > { %v2589_v20 = vmul.f32 %v3360_v19, %v2573_v2  ;;  %v3813_v21 = vadd.f32 %v2993_v17, %v2596_v18 }
0x116b   : > { %v2597_v22 = vmul.f32 %v2992_v15, %v2589_v20  ;;  %3271 = vmatprep.mubr.msk.f32.mxu1 %vm497_vm0, %v3813_v21  ;;  %v3017_v20 = vld [vmem:[%s3882_s14 + $0x1] ss:$0 sm:$0xff] }
0x116d   : > { %v2605_v23 = vadd.f32 %v2993_v17, %v2597_v22  ;;  %v3016_v17 = vld [vmem:[%s3881_s13 + $0x1] ss:$0 sm:$0xff] }
0x116f   : > { %3272 = vmatmul.mubr.msk.f32.vlgmr.msra.gmra.mxu1 %vm497_vm0, %v2605_v23 }
0x122f   : > { %v3273_v38 = vpop.f32.mrf.mxu1 }
0x1230   : > { %v2697_v39 = vadd.f32 %v3273_v38, %v2999_v37 }
0x1231   : > { %v2691_v34 = vpop.f32.mrf.mxu1 }
0x1232   : > { %v2701_v40 = vmul.f32 %v2697_v39, %v2697_v39  ;;  %v2692_v41 = vadd.f32 %v2999_v37, %v2691_v34 }
0x1234   : > { %v2703_v42 = vmul.f32 %v2701_v40, %v2697_v39  ;;  %v2700_v43 = vmul.f32 %v2692_v41, %v2692_v41 }
0x1236   : > { %v2705_v44 = vmul.f32 0.044715, %v2703_v42  ;;  %v2702_v45 = vmul.f32 %v2700_v43, %v2692_v41 }
0x1238   : > { %v2707_v46 = vadd.f32 %v2705_v44, %v2697_v39  ;;  %v2704_v47 = vmul.f32 0.044715, %v2702_v45 }
0x123a   : > { %v2709_v48 = vmul.f32 0.7978846, %v2707_v46  ;;  %v2706_v49 = vadd.f32 %v2704_v47, %v2692_v41 }
0x123c   : > { %3361 = vtanh.f32 %v2709_v48  ;;  %v2708_v50 = vmul.f32 0.7978846, %v2706_v49 }
0x123e   : > { %3363 = vtanh.f32 %v2708_v50 }
0x1249   : > { %v3362_v51 = vpop.eup %3361 }
0x124a   : > { %v2713_v52 = vadd.f32 1.0, %v3362_v51 }
0x124b   : > { %v3364_v53 = vpop.eup %3363 }
0x124c   : > { %v2712_v54 = vadd.f32 1.0, %v3364_v53  ;;  %v2715_v55 = vmul.f32 0.5, %v2713_v52 }
0x124e   : > { %v2714_v56 = vmul.f32 0.5, %v2712_v54  ;;  %v2717_v58 = vmul.f32 %v2715_v55, %v2697_v39 }
0x1250   : > { %v2716_v57 = vmul.f32 %v2714_v56, %v2692_v41 }
0x1252   : > { %3290 = vmatprep.mubr.msk.f32.mxu0 %vm1570_vm4, %v2716_v57 }
0x1253   : > { %3291 = vmatmul.mubr.msk.f32.vlgmr.msra.gmra.mxu0 %vm1570_vm4, %v2717_v58 }
0x1313   : > { %v3292_v60 = vpop.f32.mrf.mxu0 }
0x1314   : > { %v2813_v61 = vadd.f32 %v3292_v60, %v3011_v59 }
0x1315   : > { %v2807_v62 = vpop.f32.mrf.mxu0 }
0x1316   : > { %v2808_v63 = vadd.f32 %v3011_v59, %v2807_v62  ;;  %v2817_v0 = vadd.f32 %v2813_v61, %v2605_v23 }
0x1318   : > { %v2825_v1 = vsel %vm497_vm0, %v2817_v0, 0.0  ;;  %v2816_v2 = vadd.f32 %v2808_v63, %v3813_v21 }
0x1319   : > { %2826 = vadd.xlane.f32.xlu0 %v2825_v1 }
0x131a   : > { %v2822_v3 = vsel %vm497_vm0, %v2816_v2, 0.0 }
0x131b   : > { %2823 = vadd.xlane.f32.xlu1 %v2822_v3 }
0x13a2   : > { %v2827_v4 = vpop.xlane.xlu0 %2826 }
0x13a3   : > { %v2829_v5 = vmul.f32 0.03125, %v2827_v4 }
0x13a4   : > { %v2824_v6 = vpop.xlane.xlu1 %2823 }
0x13a5   : > { %v2831_v35 = vsub.f32 %v2817_v0, %v2829_v5  ;;  %v2828_v32 = vmul.f32 0.03125, %v2824_v6 }
0x13a7   : > { %v2830_v33 = vsub.f32 %v2816_v2, %v2828_v32  ;;  %v2833_v31 = vmul.f32 %v2831_v35, %v2831_v35 }
0x13a9   : > { %v2837_v7 = vsel %vm497_vm0, %v2833_v31, 0.0  ;;  %v2832_v8 = vmul.f32 %v2830_v33, %v2830_v33 }
0x13aa   : > { %2838 = vadd.xlane.f32.xlu1 %v2837_v7 }
0x13ab   : > { %v2834_v9 = vsel %vm497_vm0, %v2832_v8, 0.0 }
0x13ac   : > { %2835 = vadd.xlane.f32.xlu0 %v2834_v9 }
0x1433   : > { %v2839_v10 = vpop.xlane.xlu1 %2838 }
0x1434   : > { %v2841_v11 = vmul.f32 0.03125, %v2839_v10 }
0x1435   : > { %v2836_v12 = vpop.xlane.xlu0 %2835 }
0x1436   : > { %v2843_v13 = vadd.f32 1e-12, %v2841_v11  ;;  %v2840_v14 = vmul.f32 0.03125, %v2836_v12 }
0x1438   : > { %3365 = vrsqrt.f32 %v2843_v13  ;;  %v2842_v15 = vadd.f32 1e-12, %v2840_v14 }
0x143a   : > { %3367 = vrsqrt.f32 %v2842_v15 }
0x1445   : > { %v3366_v16 = vpop.eup %3365 }
0x1446   : > { %v2847_v18 = vmul.f32 %v3366_v16, %v2831_v35 }
0x1447   : > { %v3368_v19 = vpop.eup %3367 }
0x1448   : > { %v2855_v21 = vmul.f32 %v3016_v17, %v2847_v18  ;;  %v2846_v22 = vmul.f32 %v3368_v19, %v2830_v33 }
0x144a   : > { %v2863_v23 = vadd.f32 %v3017_v20, %v2855_v21  ;;  %v2854_v24 = vmul.f32 %v3016_v17, %v2846_v22 }
0x144c   : > { %v2865_v25 = vrot.slane %v2863_v23, 7  ;;  %v2862_v26 = vadd.f32 %v3017_v20, %v2854_v24 }
0x144e   : > { %v2868_v27 = vsel %vm2867_vm5, %v2862_v26, %v2865_v25 }
0x144f   : > { %2870 = vst.msk [vmem:[%s492_s30] sm:$0x3] %vm2869_vm6, %v2868_v27 }
0x1450 PF: > { %s25_s18 = sadd.s32 1, %s3375_s18  }
0x1451   : > { %p22_p4 = scmp.ge.s32.totalorder %s25_s18, 4  }
0x1453   :  { %24 = sbr.rel (!%p22_p4) target bundleno = 1 (0x1), region = 122 }

</bundles_post_ra>
